<compile_context>
chip_gen: v5e
topology: v5e:2x2
jax: 0.10.0
libtpu: 0.0.40
codegen_flags: <defaults>
</compile_context>

<pallas_src>
import functools

import jax
import jax.numpy as jnp
from jax import lax
from jax.experimental import pallas as pl
from jax.experimental.pallas import tpu as pltpu

NUM_CLASSES = 8
HIDDEN = 32
ALPHA = 0.5
# normalization used by the test transforms (synthetic stand-in)
NORM_MEAN = 127.5
NORM_STD = 127.5


def _segmenter_kernel(pix_ref, w1_ref, b1_ref, w2_ref, b2_ref, color_ref,
                      out_ref, *, alpha):
    # pix_ref: (3, TP) uint8 raw pixel values; channels-first so every
    # vld/vst/VPU op is 128-lane dense.
    pix_u8 = pix_ref[...]                                       # (3, TP) u8
    pix = pix_u8.astype(jnp.float32)                            # (3, TP) f32
    pix_bf = pix.astype(jnp.bfloat16)                           # exact (0..255)

    # ---- model: 1x1 conv -> ReLU -> 1x1 conv (logits) ---------------------
    # NOTE: normalization (x - MEAN) / STD is pre-folded into w1/b1.
    # bf16 operands, f32 accumulation (single-pass MXU).
    h = jnp.dot(w1_ref[...], pix_bf, preferred_element_type=jnp.float32)
    h = jnp.maximum(h + b1_ref[...], 0.0)                       # (HIDDEN, TP) f32
    logits = jnp.dot(w2_ref[...], h.astype(jnp.bfloat16),
                     preferred_element_type=jnp.float32)
    logits = logits + b2_ref[...]                               # (NC, TP) f32

    # ---- argmax over class (sublane) axis, first-max tie-break ------------
    tp = logits.shape[1]
    class_iota = lax.broadcasted_iota(jnp.int32, (NUM_CLASSES, tp), 0)
    max_val = jnp.max(logits, axis=0, keepdims=True)            # (1, TP)
    cls = jnp.min(jnp.where(logits >= max_val, class_iota, NUM_CLASSES),
                  axis=0, keepdims=True)                        # (1, TP) int32

    # ---- color lookup: (3, NC) @ onehot(NC, TP) -> lane-dense (3, TP) -----
    onehot = (class_iota == cls).astype(jnp.bfloat16)           # (NC, TP)
    mask_color = jnp.dot(color_ref[...], onehot,
                         preferred_element_type=jnp.float32)    # (3, TP), exact

    # ---- overlay blend + in-kernel uint8 output ---------------------------
    blend = pix * alpha + mask_color * (1.0 - alpha)            # >= 0 always
    blend = jnp.minimum(blend, 255.0)                           # saturate high
    # truncate like numpy's .astype(np.uint8); via int32 for safe lowering
    out_ref[...] = blend.astype(jnp.int32).astype(jnp.uint8)


def _fold_params(w1, b1, w2, b2, color_table):
    """Fold (x-MEAN)/STD into layer-1, transpose to lane-dense, cast matmul
    operands to bf16 (biases stay f32)."""
    inv_std = 1.0 / NORM_STD
    w1t = jnp.transpose(w1 * inv_std).astype(jnp.bfloat16)              # (HIDDEN, 3)
    b1t = jnp.transpose(b1 - (NORM_MEAN * inv_std)
                        * jnp.sum(w1, axis=0, keepdims=True)
                        ).astype(jnp.float32)                           # (HIDDEN, 1)
    w2t = jnp.transpose(w2).astype(jnp.bfloat16)                        # (NC, HIDDEN)
    b2t = jnp.transpose(b2).astype(jnp.float32)                         # (NC, 1)
    colort = jnp.transpose(color_table).astype(jnp.bfloat16)            # (3, NC)
    return w1t, b1t, w2t, b2t, colort


def _pick_tile(P, tile_pixels):
    """Largest tile <= tile_pixels that divides P, is a multiple of 128, and
    (preferably) keeps grid = P // tile even and >= 2 for v7x's 2 TCs."""
    assert P % 128 == 0, "H*W must be a multiple of 128"
    limit = min(tile_pixels, P)
    limit -= limit % 128
    for require_even_grid in (True, False):
        for cand in range(limit, 127, -128):
            if P % cand:
                continue
            grid = P // cand
            if require_even_grid and not (grid >= 2 and grid % 2 == 0):
                continue
            return cand
    raise ValueError(f"no valid tile for P={P}")


def segmenter_forward(img_hw3, w1, b1, w2, b2, color_table,
                      *, alpha=ALPHA, tile_pixels=32768):
    """img_hw3: (H, W, 3) uint8 image. Returns (H, W, 3) uint8 painted image."""
    H, W, C = img_hw3.shape
    assert C == 3
    P = H * W
    tp = _pick_tile(P, tile_pixels)

    if img_hw3.dtype != jnp.uint8:
        img_hw3 = img_hw3.astype(jnp.uint8)

    # channels-first, lane-dense layout; layout change done while data is u8
    pixels = jnp.transpose(img_hw3.reshape(P, C))                       # (3, P) u8

    w1t, b1t, w2t, b2t, colort = _fold_params(w1, b1, w2, b2, color_table)

    full = lambda shape: pl.BlockSpec(shape, lambda i: (0, 0))

    out = pl.pallas_call(
        functools.partial(_segmenter_kernel, alpha=alpha),
        out_shape=jax.ShapeDtypeStruct((C, P), jnp.uint8),
        grid_spec=pltpu.PrefetchScalarGridSpec(
            num_scalar_prefetch=0,
            grid=(P // tp,),
            in_specs=[
                pl.BlockSpec((C, tp), lambda i: (0, i)),        # pixels (u8)
                full((HIDDEN, C)),                              # w1t (bf16)
                full((HIDDEN, 1)),                              # b1t (f32)
                full((NUM_CLASSES, HIDDEN)),                    # w2t (bf16)
                full((NUM_CLASSES, 1)),                         # b2t (f32)
                full((C, NUM_CLASSES)),                         # colors (bf16)
            ],
            out_specs=pl.BlockSpec((C, tp), lambda i: (0, i)),
        ),
        compiler_params=pltpu.CompilerParams(
            dimension_semantics=("parallel",),                  # 2-TC sharding on v7x
            vmem_limit_bytes=48 * 1024 * 1024),
    )(pixels, w1t, b1t, w2t, b2t, colort)

    # output layout change back to HWC is done at u8 (cheap)
    return jnp.transpose(out).reshape(H, W, C)                  # (H, W, 3) uint8


def segmenter_reference(img_hw3_u8, w1, b1, w2, b2, color_table, *, alpha=ALPHA):
    """Pure-JAX reference mirroring the kernel numerics (folded normalization,
    bf16 matmul operands, f32 accumulation, truncating u8 cast)."""
    H, W, C = img_hw3_u8.shape
    w1t, b1t, w2t, b2t, _ = _fold_params(w1, b1, w2, b2, color_table)
    pix = jnp.transpose(img_hw3_u8.reshape(-1, C)).astype(jnp.float32)  # (3, P)
    h = jnp.maximum(jnp.dot(w1t, pix.astype(jnp.bfloat16),
                            preferred_element_type=jnp.float32) + b1t, 0.0)
    logits = jnp.dot(w2t, h.astype(jnp.bfloat16),
                     preferred_element_type=jnp.float32) + b2t
    cls = jnp.argmax(logits, axis=0)                                    # (P,)
    mask = jnp.transpose(color_table.astype(jnp.float32)[cls])          # (3, P)
    blend = jnp.minimum(pix * alpha + mask * (1.0 - alpha), 255.0)
    out = blend.astype(jnp.int32).astype(jnp.uint8)
    return jnp.transpose(out).reshape(H, W, C)


if __name__ == "__main__":
    key = jax.random.PRNGKey(0)
    k_img, k_w1, k_b1, k_w2, k_b2 = jax.random.split(key, 5)

    H = W = 64  # small "self.size" for the synthetic test (P=4096 -> grid=2)

    # deterministic synthetic model parameters
    w1 = jax.random.normal(k_w1, (3, HIDDEN), jnp.float32) * 0.5
    b1 = jax.random.normal(k_b1, (1, HIDDEN), jnp.float32) * 0.1
    w2 = jax.random.normal(k_w2, (HIDDEN, NUM_CLASSES), jnp.float32) * 0.5
    b2 = jax.random.normal(k_b2, (1, NUM_CLASSES), jnp.float32) * 0.1

    # deterministic color map: NUM_CLASSES distinct RGB triples (ints <= 255)
    color_table = jnp.stack(
        [jnp.array([(37 * c) % 256, (91 * c + 13) % 256, (151 * c + 7) % 256],
                   dtype=jnp.float32) for c in range(NUM_CLASSES)], axis=0)

    # input image (h, w, 3) uint8, like a photo
    img = jax.random.randint(k_img, (H, W, 3), 0, 256, dtype=jnp.int32
                             ).astype(jnp.uint8)

    out = segmenter_forward(img, w1, b1, w2, b2, color_table)
    out = jax.block_until_ready(out)
    assert out.shape == (H, W, 3) and out.dtype == jnp.uint8

    # pure-JAX reference (same numerics as the kernel) as a correctness check.
    # NOTE: vs a pure-f32 un-folded reference, bf16 matmul operands can flip
    # argmax for near-tie pixels; that is inherent to the bf16 optimization.
    ref = segmenter_reference(img, w1, b1, w2, b2, color_table)
    match = float(jnp.mean((out == ref).astype(jnp.float32)))
    assert match > 0.99, f"mismatch: only {match:.4f} of values equal"

    print("KERNEL_OK")
</pallas_src>

<mosaic_0001>
module attributes {stable_mosaic.version = 11 : i64} {
  func.func @_segmenter_kernel(%arg0: i32, %arg1: memref<3x2048xi8, #tpu.memory_space<vmem>>, %arg2: memref<32x3xbf16, #tpu.memory_space<vmem>>, %arg3: memref<32x1xf32, #tpu.memory_space<vmem>>, %arg4: memref<8x32xbf16, #tpu.memory_space<vmem>>, %arg5: memref<8x1xf32, #tpu.memory_space<vmem>>, %arg6: memref<3x8xbf16, #tpu.memory_space<vmem>>, %arg7: memref<3x2048xi8, #tpu.memory_space<vmem>>) attributes {dimension_semantics = [#tpu.dimension_semantics<parallel>], iteration_bounds = array<i64: 2>, scalar_prefetch = 0 : i64, scratch_operands = 0 : i64, tpu.core_type = #tpu.core_type<tc>, window_params = [{transform_indices = @transform_0, window_bounds = array<i64: 3, 2048>}, {pipeline_mode = #tpu.pipeline_mode<synchronous>, transform_indices = @transform_1, window_bounds = array<i64: 32, 3>}, {pipeline_mode = #tpu.pipeline_mode<synchronous>, transform_indices = @transform_2, window_bounds = array<i64: 32, 1>}, {pipeline_mode = #tpu.pipeline_mode<synchronous>, transform_indices = @transform_3, window_bounds = array<i64: 8, 32>}, {pipeline_mode = #tpu.pipeline_mode<synchronous>, transform_indices = @transform_4, window_bounds = array<i64: 8, 1>}, {pipeline_mode = #tpu.pipeline_mode<synchronous>, transform_indices = @transform_5, window_bounds = array<i64: 3, 8>}, {transform_indices = @transform_6, window_bounds = array<i64: 3, 2048>}]} {
    %c0 = arith.constant 0 : index
    %c0_0 = arith.constant 0 : index
    %0 = vector.load %arg1[%c0, %c0_0] : memref<3x2048xi8, #tpu.memory_space<vmem>>, vector<3x2048xi8>
    %1 = arith.uitofp %0 : vector<3x2048xi8> to vector<3x2048xf32>
    %2 = arith.truncf %1 : vector<3x2048xf32> to vector<3x2048xbf16>
    %c0_1 = arith.constant 0 : index
    %c0_2 = arith.constant 0 : index
    %3 = vector.load %arg2[%c0_1, %c0_2] : memref<32x3xbf16, #tpu.memory_space<vmem>>, vector<32x3xbf16>
    %cst = arith.constant dense<0.000000e+00> : vector<32x2048xf32>
    %4 = tpu.matmul %3, %2, %cst {dimension_numbers = #tpu.dot_dimension_numbers<[1], [0], [0], [1], [0, 0, 1, 1], [], []>} : vector<32x3xbf16>, vector<3x2048xbf16>, vector<32x2048xf32> -> vector<32x2048xf32>
    %c0_3 = arith.constant 0 : index
    %c0_4 = arith.constant 0 : index
    %5 = vector.load %arg3[%c0_3, %c0_4] : memref<32x1xf32, #tpu.memory_space<vmem>>, vector<32x1xf32>
    %6 = vector.broadcast %5 : vector<32x1xf32> to vector<32x2048xf32>
    %7 = arith.addf %4, %6 : vector<32x2048xf32>
    %cst_5 = arith.constant 0.000000e+00 : f32
    %8 = vector.broadcast %cst_5 : f32 to vector<32x2048xf32>
    %9 = arith.maximumf %7, %8 : vector<32x2048xf32>
    %c0_6 = arith.constant 0 : index
    %c0_7 = arith.constant 0 : index
    %10 = vector.load %arg4[%c0_6, %c0_7] : memref<8x32xbf16, #tpu.memory_space<vmem>>, vector<8x32xbf16>
    %11 = arith.truncf %9 : vector<32x2048xf32> to vector<32x2048xbf16>
    %cst_8 = arith.constant dense<0.000000e+00> : vector<8x2048xf32>
    %12 = tpu.matmul %10, %11, %cst_8 {dimension_numbers = #tpu.dot_dimension_numbers<[1], [0], [0], [1], [0, 0, 1, 1], [], []>} : vector<8x32xbf16>, vector<32x2048xbf16>, vector<8x2048xf32> -> vector<8x2048xf32>
    %c0_9 = arith.constant 0 : index
    %c0_10 = arith.constant 0 : index
    %13 = vector.load %arg5[%c0_9, %c0_10] : memref<8x1xf32, #tpu.memory_space<vmem>>, vector<8x1xf32>
    %14 = vector.broadcast %13 : vector<8x1xf32> to vector<8x2048xf32>
    %15 = arith.addf %12, %14 : vector<8x2048xf32>
    %16 = tpu.iota {dimensions = array<i32: 0>} : vector<8x2048xi32>
    %cst_11 = arith.constant dense<0xFF800000> : vector<2048xf32>
    %17 = vector.multi_reduction <maximumf>, %15, %cst_11 [0] : vector<8x2048xf32> to vector<2048xf32>
    %18 = vector.shape_cast %17 : vector<2048xf32> to vector<1x2048xf32>
    %19 = vector.broadcast %18 : vector<1x2048xf32> to vector<8x2048xf32>
    %20 = arith.cmpf oge, %15, %19 : vector<8x2048xf32>
    %c8_i32 = arith.constant 8 : i32
    %21 = vector.broadcast %c8_i32 : i32 to vector<8x2048xi32>
    %22 = arith.select %20, %16, %21 : vector<8x2048xi1>, vector<8x2048xi32>
    %cst_12 = arith.constant dense<2147483647> : vector<2048xi32>
    %23 = vector.multi_reduction <minsi>, %22, %cst_12 [0] : vector<8x2048xi32> to vector<2048xi32>
    %24 = vector.shape_cast %23 : vector<2048xi32> to vector<1x2048xi32>
    %25 = vector.broadcast %24 : vector<1x2048xi32> to vector<8x2048xi32>
    %26 = arith.cmpi eq, %16, %25 : vector<8x2048xi32>
    %27 = arith.extui %26 : vector<8x2048xi1> to vector<8x2048xi32>
    %28 = arith.sitofp %27 : vector<8x2048xi32> to vector<8x2048xf32>
    %29 = arith.truncf %28 : vector<8x2048xf32> to vector<8x2048xbf16>
    %c0_13 = arith.constant 0 : index
    %c0_14 = arith.constant 0 : index
    %30 = vector.load %arg6[%c0_13, %c0_14] : memref<3x8xbf16, #tpu.memory_space<vmem>>, vector<3x8xbf16>
    %cst_15 = arith.constant dense<0.000000e+00> : vector<3x2048xf32>
    %31 = tpu.matmul %30, %29, %cst_15 {dimension_numbers = #tpu.dot_dimension_numbers<[1], [0], [0], [1], [0, 0, 1, 1], [], []>} : vector<3x8xbf16>, vector<8x2048xbf16>, vector<3x2048xf32> -> vector<3x2048xf32>
    %cst_16 = arith.constant 5.000000e-01 : f32
    %32 = vector.broadcast %cst_16 : f32 to vector<3x2048xf32>
    %33 = arith.mulf %1, %32 : vector<3x2048xf32>
    %cst_17 = arith.constant 5.000000e-01 : f32
    %34 = vector.broadcast %cst_17 : f32 to vector<3x2048xf32>
    %35 = arith.mulf %31, %34 : vector<3x2048xf32>
    %36 = arith.addf %33, %35 : vector<3x2048xf32>
    %cst_18 = arith.constant 2.550000e+02 : f32
    %37 = vector.broadcast %cst_18 : f32 to vector<3x2048xf32>
    %38 = arith.minimumf %36, %37 : vector<3x2048xf32>
    %39 = arith.fptosi %38 : vector<3x2048xf32> to vector<3x2048xi32>
    %40 = arith.trunci %39 : vector<3x2048xi32> to vector<3x2048xi8>
    %c0_19 = arith.constant 0 : index
    %c0_20 = arith.constant 0 : index
    %41 = vector.load %arg7[%c0_19, %c0_20] : memref<3x2048xi8, #tpu.memory_space<vmem>>, vector<3x2048xi8>
    tpu.vector_store %arg7[%c0_19, %c0_20], %40 {strides = array<i32>} : memref<3x2048xi8, #tpu.memory_space<vmem>>, vector<3x2048xi8>,
    return
  }
  func.func @transform_0(%arg0: i32) -> (i32, i32) {
    %c0_i32 = arith.constant 0 : i32
    %c0_i32_0 = arith.constant 0 : i32
    return %c0_i32, %arg0 : i32, i32
  }
  func.func @transform_1(%arg0: i32) -> (i32, i32) {
    %c0_i32 = arith.constant 0 : i32
    %c0_i32_0 = arith.constant 0 : i32
    %c0_i32_1 = arith.constant 0 : i32
    return %c0_i32, %c0_i32_0 : i32, i32
  }
  func.func @transform_2(%arg0: i32) -> (i32, i32) {
    %c0_i32 = arith.constant 0 : i32
    %c0_i32_0 = arith.constant 0 : i32
    %c0_i32_1 = arith.constant 0 : i32
    return %c0_i32, %c0_i32_0 : i32, i32
  }
  func.func @transform_3(%arg0: i32) -> (i32, i32) {
    %c0_i32 = arith.constant 0 : i32
    %c0_i32_0 = arith.constant 0 : i32
    %c0_i32_1 = arith.constant 0 : i32
    return %c0_i32, %c0_i32_0 : i32, i32
  }
  func.func @transform_4(%arg0: i32) -> (i32, i32) {
    %c0_i32 = arith.constant 0 : i32
    %c0_i32_0 = arith.constant 0 : i32
    %c0_i32_1 = arith.constant 0 : i32
    return %c0_i32, %c0_i32_0 : i32, i32
  }
  func.func @transform_5(%arg0: i32) -> (i32, i32) {
    %c0_i32 = arith.constant 0 : i32
    %c0_i32_0 = arith.constant 0 : i32
    %c0_i32_1 = arith.constant 0 : i32
    return %c0_i32, %c0_i32_0 : i32, i32
  }
  func.func @transform_6(%arg0: i32) -> (i32, i32) {
    %c0_i32 = arith.constant 0 : i32
    %c0_i32_0 = arith.constant 0 : i32
    return %c0_i32, %arg0 : i32, i32
  }
}

</mosaic_0001>

<bundles_post_ra>
// kernel: tpu_custom_call.1
= control target key start
LH: loop header
LB: loop body
LE: loop exit
PB: predicated region body
PF: predicated region fallthrough
CT: control target
= control target key end

     0   :  { %11 = vsyncpa [#allocation3], 0  ;;  %s2807_s0 = inlined_call_operand.vmem [shape: u8[3,4096], index: 0, kind: input, shape index: {}]   ;;  %s2808_s1 = inlined_call_operand.vmem [shape: bf16[32,3], index: 1, kind: input, shape index: {}]   ;;  %s2809_s2 = inlined_call_operand.vmem [shape: f32[32,1], index: 2, kind: input, shape index: {}]   ;;  %s2810_s3 = inlined_call_operand.vmem [shape: bf16[8,32], index: 3, kind: input, shape index: {}]   ;;  %s2811_s4 = inlined_call_operand.vmem [shape: f32[8,1], index: 4, kind: input, shape index: {}]   ;;  %s2812_s5 = inlined_call_operand.vmem [shape: bf16[3,8], index: 5, kind: input, shape index: {}]   ;;  %s2813_s6 = inlined_call_operand.hbm [shape: u8[3,4096], index: 6, kind: output, shape index: {}]  }
   0x1   :  { %13 = vsyncpa [#allocation3 + $0x1], 0  ;;  %s2253_s21 = smov 0   ;;  %s2255_s22 = smov 0  }
   0x2   :  { %s2257_s23 = smov 0   ;;  %s2259_s24 = smov 0  }
   0x3 LB: > { %s1965_s25 = sadd.s32 4294967295, %s2213_s24   ;;  %s1966_s26 = sadd.s32 4294967294, %s2213_s24   ;;  %s2213_s24 = sphi %s2259_s24, %s2833_s24   ;;  %s2209_s23 = sphi %s2257_s23, %s2832_s23   ;;  %s2205_s22 = sphi %s2255_s22, %s2831_s22   ;;  %s2201_s21 = sphi %s2253_s21, %s2830_s21  }
   0x4   : > { %s2276_s27 = sadd.s32 1, %s2213_s24   ;;  %s157_s28 = sadd.s32 1, %s2209_s23 }
   0x5   : > { %s154_s29 = ssub.s32 %s2213_s24, %s2276_s27  ;;  %p167_p0 = scmp.ne.s32.totalorder %s2209_s23, %s2205_s22 }
   0x6   : > { %p155_p1 = scmp.eq.s32.totalorder %s154_s29, 0  ;;  %p168_p2 = scmp.eq.s32.totalorder %s1965_s25, 1 }
   0x7   : > { %p173_p3 = scmp.ne.s32.totalorder %s2205_s22, %s2201_s21  ;;  %p174_p4 = scmp.eq.s32.totalorder %s1966_s26, 1 }
   0x8   : > { %s2286_s30 = scalar_select %p155_p1, %s2209_s23, %s157_s28  }
   0x9   : > { %p2288_p5 = por %p168_p2, %p167_p0  ;;  %p2292_p6 = por %p174_p4, %p173_p3 }
   0xa   : > { %p1969_p7 = scmp.ge.s32.totalorder %s2213_s24, 1  ;;  %p215_p8 = scmp.lt.s32.totalorder %s2213_s24, 3 }
   0xc   : > { %p216_p9 = pnand %p1969_p7, %p215_p8 }
   0xd   : > { %s2298_s9 = sshll.u32 (!%p216_p9), %s1965_s25, 4  ;;  %s241_s17 = sand.u32 (!%p216_p9), 1, %s2205_s22  }
   0xe   : > { %219 = sbr.rel (%p216_p9) target bundleno = 646 (0x286), region = 44  ;;  %p245_p10 = scmp.lt.s32.totalorder (!%p216_p9), %s2298_s9, 31 }
   0xf   : > { %s1970_s18 = sshll.u32 (!%p216_p9), %s241_s17, 4  ;;  %s1905_s26 = scalar_lea.hbm (!%p216_p9), %s2813_s6, %s2298_s9 }
  0x10   : > { %s2739_s19 = scalar_lea.vmem (!%p216_p9), [#allocation2], %s1970_s18  ;;  %s1909_s29 = sshll.u32 (!%p216_p9), %s1905_s26, 4  ;;  %s1910_s29 = int_to_ptr.hbm [resolvable:$true] %s1909_s29 }
  0x11   : > { %s1907_s28 = sshll.u32 (!%p216_p9), %s2739_s19, 4  ;;  %s2171_s14 = scalar_lea.hbm (!%p216_p9), %s2813_s6, 32  ;;  %s1908_s28 = int_to_ptr.vmem [resolvable:$true] %s1907_s28 }
  0x13   : > { %v2215_v0 = vmov 0   ;;  %s246_s10 = scalar_select %p245_p10, %s2298_s9, 31  ;;  %vm389_vm0 = vcmask 1040384   ;;  %v348_v18 = vld [vmem:[%s2809_s2] sm:$0xff]  ;;  %v350_v19 = vld [vmem:[%s2809_s2 + $0x10] sm:$0xff]  ;;  %vm390_vm1 = vcmask 1041408  }
  0x14   : > { %2149 = vset.pattern.permute.xlu1 %v2215_v0  ;;  %2148 = vset.pattern.permute.xlu0 %v2215_v0  ;;  %v2216_v23 = vmov 65535   ;;  %v349_v36 = vld [vmem:[%s2809_s2 + $0x8] sm:$0xff]  ;;  %v2360_v47 = vld [vmem:[%s2808_s1] sm:$0xff]  ;;  %vm382_vm2 = vcmask 23552   ;;  %v351_v58 = vld [vmem:[%s2809_s2 + $0x18] sm:$0xff]  ;;  %vm848_vm3 = vcmask 261120  }
  0x15   : > { %2150 = vset.pattern.permute.xlu2 %v2215_v0  ;;  %s247_s13 = scalar_lea.vmem %s2807_s0, %s246_s10  ;;  %354 = vperm.xlu1 %2149, %v348_v18   ;;  %v391_v24 = vsel %vm389_vm0, 4294967295, %v2216_v23  ;;  %s1895_s9 = scalar_lea.sflag [#allocation3], %s241_s17 }
  0x16   : > { %v251_v1 = vld [vmem:[%s247_s13] sm:$0xff]  ;;  %v252_v2 = vld [vmem:[%s247_s13 + $0x8] sm:$0xff]  ;;  %364 = vperm.xlu0 %2148, %v350_v19   ;;  %v2342_v28 = vsel %vm390_vm1, %v391_v24, 0  ;;  %s2165_s10 = sshra.s32 %s1910_s29, 4  ;;  %s2166_s10 = int_to_ptr.hbm [resolvable:$true] %s2165_s10 }
  0x17   : > { %v253_v3 = vunpack.c.0.s8 %v251_v1  ;;  %v254_v4 = vunpack.c.1.s8 %v251_v1  ;;  %v256_v5 = vunpack.c.3.s8 %v251_v1  ;;  %v257_v7 = vunpack.c.0.s8 %v252_v2  ;;  %s2167_s11 = scalar_lea.hbm %s2166_s10, 16  ;;  %p2172_p0 = scmp.lt.s32.totalorder %s2166_s10, %s2813_s6 }
  0x18   : > { %v255_v10 = vunpack.c.2.s8 %v251_v1  ;;  %v258_v13 = vunpack.c.1.s8 %v252_v2  ;;  %v260_v15 = vunpack.c.3.s8 %v252_v2  ;;  %v259_v21 = vunpack.c.2.s8 %v252_v2  ;;  %v2065_v1 = vld [vmem:[%s2808_s1 + $0x8] sm:$0xff]  ;;  %p2168_p11 = scmp.ne.s32.totalorder %s2166_s10, %s2167_s11  ;;  %p2173_p1 = scmp.lt.s32.totalorder %s2171_s14, %s2167_s11 }
  0x19   : > { %v2305_v6 = vand.u32 255, %v253_v3  ;;  %v2307_v8 = vand.u32 255, %v254_v4  ;;  %v2309_v9 = vand.u32 255, %v256_v5  ;;  %v2318_v17 = vand.u32 255, %v257_v7 }
  0x1a   : > { %v2314_v16 = vand.u32 255, %v255_v10  ;;  %v2329_v22 = vand.u32 255, %v258_v13  ;;  %v2334_v25 = vand.u32 255, %v260_v15  ;;  %v2339_v27 = vand.u32 255, %v259_v21  ;;  %p2169_p12 = pnand %p2168_p11, %p2288_p5  ;;  %p2174_p2 = por %p2173_p1, %p2172_p0 }
  0x1b   : > { %v269_v11 = vcvt.s32.f32 %v2305_v6  ;;  %v270_v12 = vcvt.s32.f32 %v2307_v8  ;;  %v272_v14 = vcvt.s32.f32 %v2309_v9  ;;  %v273_v26 = vcvt.s32.f32 %v2318_v17 }
  0x1c   : > { %v271_v20 = vcvt.s32.f32 %v2314_v16  ;;  %v274_v29 = vcvt.s32.f32 %v2329_v22  ;;  %v276_v32 = vcvt.s32.f32 %v2334_v25  ;;  %v275_v40 = vcvt.s32.f32 %v2339_v27  ;;  %p2170_p13 = pneg %p2169_p12 }
  0x1d   : > { %285 = vst [vmem:[#allocation1] ss:$2 sm:$0xff] %v269_v11  ;;  %359 = vperm.xlu1 %2149, %v349_v36   ;;  %v1661_v6 = vmul.f32 0.5, %v270_v12 }
  0x1e   : > { %287 = vst [vmem:[#allocation1 + $0x10] ss:$2 sm:$0xff] %v270_v12  ;;  %369 = vperm.xlu0 %2148, %v351_v58   ;;  %v1666_v22 = vmul.f32 0.5, %v275_v40  ;;  %v1667_v27 = vmul.f32 0.5, %v276_v32  ;;  %p2175_p3 = pnand %p2174_p2, %p2170_p13 }
  0x1f   : > { %291 = vst [vmem:[#allocation1 + $0x30] ss:$2 sm:$0xff] %v272_v14 }
  0x20   : > { %289 = vst [vmem:[#allocation1 + $0x20] ss:$2 sm:$0xff] %v271_v20 }
  0x24   : > { %v292_v30 = vld.sshfl [vmem:[#allocation1] sm:$0xff pattern:$0x75316420]  ;;  %v293_v31 = vld.sshfl [vmem:[#allocation1 + $0x8] sm:$0xff pattern:$0x75316420] }
  0x25   : > { %v328_v33 = vpack.c.bf16 %v292_v30, %v292_v30  ;;  %300 = vst [vmem:[#allocation1] ss:$2 sm:$0xff] %v273_v26  ;;  %v329_v34 = vpack.c.bf16 %v293_v31, %v293_v31  ;;  %v294_v35 = vld.sshfl [vmem:[#allocation1 + $0x10] sm:$0xff pattern:$0x75316420] }
  0x26   : > { %v330_v37 = vpack.c.bf16 %v294_v35, %v294_v35  ;;  %v295_v38 = vld.sshfl [vmem:[#allocation1 + $0x18] sm:$0xff pattern:$0x75316420]  ;;  %v298_v45 = vld.sshfl [vmem:[#allocation1 + $0x30] sm:$0xff pattern:$0x75316420] }
  0x27   : > { %v299_v39 = vld.sshfl [vmem:[#allocation1 + $0x38] sm:$0xff pattern:$0x75316420]  ;;  %v394_v41 = vand.u32 %v2342_v28, %v328_v33  ;;  %v397_v42 = vand.u32 %v2342_v28, %v329_v34  ;;  %301 = vst [vmem:[#allocation1 + $0x10] ss:$2 sm:$0xff] %v274_v29  ;;  %v331_v43 = vpack.c.bf16 %v295_v38, %v295_v38  ;;  %v334_v48 = vpack.c.bf16 %v298_v45, %v298_v45 }
  0x28   : > { %v335_v44 = vpack.c.bf16 %v299_v39, %v299_v39  ;;  %v400_v46 = vand.u32 %v2342_v28, %v330_v37  ;;  %303 = vst [vmem:[#allocation1 + $0x30] ss:$2 sm:$0xff] %v276_v32  ;;  %v296_v49 = vld.sshfl [vmem:[#allocation1 + $0x20] sm:$0xff pattern:$0x75316420] }
  0x29   : > { %448 = vmatpush.bf16.msra.mxu0 %v394_v41  ;;  %467 = vmatpush.bf16.msra.mxu1 %v397_v42  ;;  %v403_v50 = vand.u32 %v2342_v28, %v331_v43  ;;  %v332_v52 = vpack.c.bf16 %v296_v49, %v296_v49  ;;  %v297_v53 = vld.sshfl [vmem:[#allocation1 + $0x28] sm:$0xff pattern:$0x75316420]  ;;  %v412_v54 = vand.u32 %v2342_v28, %v334_v48 }
  0x2a   : > { %v415_v51 = vand.u32 %v2342_v28, %v335_v44  ;;  %486 = vmatpush.bf16.msra.mxu2 %v400_v46  ;;  %302 = vst [vmem:[#allocation1 + $0x20] ss:$2 sm:$0xff] %v275_v40  ;;  %v333_v55 = vpack.c.bf16 %v297_v53, %v297_v53 }
  0x2b   : > { %505 = vmatpush.bf16.msra.mxu3 %v403_v50  ;;  %v406_v56 = vand.u32 %v2342_v28, %v332_v52 }
  0x2c   : > { %1980 = vmatmul.msk.bf16.vlgmr.msra.gmra.mxu0 %vm382_vm2, %v2360_v47  ;;  %1982 = vmatmul.msk.bf16.vlgmr.msra.gmra.mxu1 %vm382_vm2, %v2360_v47  ;;  %v409_v57 = vand.u32 %v2342_v28, %v333_v55  ;;  %v304_v2 = vld.sshfl [vmem:[#allocation1] sm:$0xff pattern:$0x75316420]  ;;  %v305_v3 = vld.sshfl [vmem:[#allocation1 + $0x8] sm:$0xff pattern:$0x75316420] }
  0x2d   : > { %1984 = vmatmul.msk.bf16.vlgmr.msra.gmra.mxu2 %vm382_vm2, %v2360_v47  ;;  %524 = vmatpush.bf16.msrb.mxu0 %v406_v56  ;;  %v336_v4 = vpack.c.bf16 %v304_v2, %v304_v2  ;;  %v337_v5 = vpack.c.bf16 %v305_v3, %v305_v3 }
  0x2e   : > { %1986 = vmatmul.msk.bf16.vlgmr.msra.gmra.mxu3 %vm382_vm2, %v2360_v47  ;;  %562 = vmatpush.bf16.msrb.mxu2 %v412_v54  ;;  %v307_v59 = vld.sshfl [vmem:[#allocation1 + $0x18] sm:$0xff pattern:$0x75316420]  ;;  %v306_v61 = vld.sshfl [vmem:[#allocation1 + $0x10] sm:$0xff pattern:$0x75316420] }
  0x2f   : > { %581 = vmatpush.bf16.msrb.mxu3 %v415_v51  ;;  %543 = vmatpush.bf16.msrb.mxu1 %v409_v57  ;;  %v339_v60 = vpack.c.bf16 %v307_v59, %v307_v59  ;;  %v338_v62 = vpack.c.bf16 %v306_v61, %v306_v61  ;;  %v418_v7 = vand.u32 %v2342_v28, %v336_v4  ;;  %v311_v13 = vld.sshfl [vmem:[#allocation1 + $0x38] sm:$0xff pattern:$0x75316420]  ;;  %v310_v15 = vld.sshfl [vmem:[#allocation1 + $0x30] sm:$0xff pattern:$0x75316420] }
  0x30   : > { %v421_v10 = vand.u32 %v2342_v28, %v337_v5  ;;  %v343_v18 = vpack.c.bf16 %v311_v13, %v311_v13  ;;  %v342_v19 = vpack.c.bf16 %v310_v15, %v310_v15 }
  0x31   : > { %v427_v63 = vand.u32 %v2342_v28, %v339_v60  ;;  %v424_v0 = vand.u32 %v2342_v28, %v338_v62  ;;  %600 = vmatpush.bf16.msra.mxu0 %v418_v7  ;;  %v308_v24 = vld.sshfl [vmem:[#allocation1 + $0x20] sm:$0xff pattern:$0x75316420]  ;;  %v309_v30 = vld.sshfl [vmem:[#allocation1 + $0x28] sm:$0xff pattern:$0x75316420] }
  0x32   : > { %v439_v21 = vand.u32 %v2342_v28, %v343_v18  ;;  %v436_v23 = vand.u32 %v2342_v28, %v342_v19  ;;  %v340_v31 = vpack.c.bf16 %v308_v24, %v308_v24  ;;  %v341_v33 = vpack.c.bf16 %v309_v30, %v309_v30 }
  0x33   : > { %657 = vmatpush.bf16.msra.mxu3 %v427_v63  ;;  %638 = vmatpush.bf16.msra.mxu2 %v424_v0 }
  0x34   : > { %619 = vmatpush.bf16.msra.mxu1 %v421_v10  ;;  %v430_v34 = vand.u32 %v2342_v28, %v340_v31  ;;  %v433_v35 = vand.u32 %v2342_v28, %v341_v33 }
  0x3c   : > { %1981 = vmatmul.msk.bf16.gmra.mxu0 %vm382_vm2, %v2065_v1  ;;  %1983 = vmatmul.msk.bf16.gmra.mxu1 %vm382_vm2, %v2065_v1 }
  0x3d   : > { %1985 = vmatmul.msk.bf16.gmra.mxu2 %vm382_vm2, %v2065_v1 }
  0x3e   : > { %1987 = vmatmul.msk.bf16.gmra.mxu3 %vm382_vm2, %v2065_v1 }
  0x4c   : > { %1988 = vmatmul.msk.bf16.vlgmr.msrb.gmra.mxu0 %vm382_vm2, %v2360_v47  ;;  %1990 = vmatmul.msk.bf16.vlgmr.msrb.gmra.mxu1 %vm382_vm2, %v2360_v47 }
  0x4d   : > { %1992 = vmatmul.msk.bf16.vlgmr.msrb.gmra.mxu2 %vm382_vm2, %v2360_v47  ;;  %676 = vmatpush.bf16.msrb.mxu0 %v430_v34 }
  0x4e   : > { %1994 = vmatmul.msk.bf16.vlgmr.msrb.gmra.mxu3 %vm382_vm2, %v2360_v47  ;;  %714 = vmatpush.bf16.msrb.mxu2 %v436_v23 }
  0x4f   : > { %733 = vmatpush.bf16.msrb.mxu3 %v439_v21  ;;  %695 = vmatpush.bf16.msrb.mxu1 %v433_v35 }
  0x5c   : > { %1989 = vmatmul.msk.bf16.gmra.mxu0 %vm382_vm2, %v2065_v1  ;;  %1991 = vmatmul.msk.bf16.gmra.mxu1 %vm382_vm2, %v2065_v1 }
  0x5d   : > { %1993 = vmatmul.msk.bf16.gmra.mxu2 %vm382_vm2, %v2065_v1 }
  0x5e   : > { %1995 = vmatmul.msk.bf16.gmra.mxu3 %vm382_vm2, %v2065_v1 }
  0x6c   : > { %1996 = vmatmul.msk.bf16.vlgmr.msra.gmra.mxu0 %vm382_vm2, %v2360_v47  ;;  %1998 = vmatmul.msk.bf16.vlgmr.msra.gmra.mxu1 %vm382_vm2, %v2360_v47 }
  0x6d   : > { %2000 = vmatmul.msk.bf16.vlgmr.msra.gmra.mxu2 %vm382_vm2, %v2360_v47 }
  0x6e   : > { %2002 = vmatmul.msk.bf16.vlgmr.msra.gmra.mxu3 %vm382_vm2, %v2360_v47 }
  0x7c   : > { %1997 = vmatmul.msk.bf16.gmra.mxu0 %vm382_vm2, %v2065_v1  ;;  %1999 = vmatmul.msk.bf16.gmra.mxu1 %vm382_vm2, %v2065_v1 }
  0x7d   : > { %2001 = vmatmul.msk.bf16.gmra.mxu2 %vm382_vm2, %v2065_v1 }
  0x7e   : > { %2003 = vmatmul.msk.bf16.gmra.mxu3 %vm382_vm2, %v2065_v1 }
  0x87   : > { %v2435_v43 = vpop.permute.xlu1 %354 }
  0x88   : > { %v2433_v42 = vpop.permute.xlu0 %364 }
  0x8c   : > { %2004 = vmatmul.msk.bf16.vlgmr.msrb.gmra.mxu0 %vm382_vm2, %v2360_v47  ;;  %2006 = vmatmul.msk.bf16.vlgmr.msrb.gmra.mxu1 %vm382_vm2, %v2360_v47 }
  0x8d   : > { %2008 = vmatmul.msk.bf16.vlgmr.msrb.gmra.mxu2 %vm382_vm2, %v2360_v47 }
  0x8e   : > { %2010 = vmatmul.msk.bf16.vlgmr.msrb.gmra.mxu3 %vm382_vm2, %v2360_v47 }
  0x8f   : > { %v2441_v51 = vpop.permute.xlu1 %359 }
  0x90   : > { %v2439_v50 = vpop.permute.xlu0 %369 }
  0x9c   : > { %2005 = vmatmul.msk.bf16.gmra.mxu0 %vm382_vm2, %v2065_v1  ;;  %2007 = vmatmul.msk.bf16.gmra.mxu1 %vm382_vm2, %v2065_v1 }
  0x9d   : > { %2009 = vmatmul.msk.bf16.gmra.mxu2 %vm382_vm2, %v2065_v1 }
  0x9e   : > { %2011 = vmatmul.msk.bf16.gmra.mxu3 %vm382_vm2, %v2065_v1 }
  0xa9   : > { %v450_v28 = vpop.f32.mrf.mxu0  ;;  %v469_v36 = vpop.f32.mrf.mxu1 }
  0xaa   : > { %v451_v58 = vadd.f32 %v450_v28, %v2435_v43  ;;  %v470_v62 = vadd.f32 %v469_v36, %v2435_v43 }
  0xac   : > { %v745_v3 = vmax.f32 %v451_v58, 0.0  ;;  %v746_v10 = vmax.f32 %v470_v62, 0.0 }
  0xb0   : > { %v488_v37 = vpop.f32.mrf.mxu2 }
  0xb1   : > { %v507_v38 = vpop.f32.mrf.mxu3  ;;  %v452_v39 = vpop.f32.mrf.mxu0  ;;  %v489_v35 = vadd.f32 %v488_v37, %v2435_v43 }
  0xb2   : > { %v471_v41 = vpop.f32.mrf.mxu1  ;;  %v453_v59 = vadd.f32 %v452_v39, %v2441_v51 }
  0xb3   : > { %v472_v63 = vadd.f32 %v471_v41, %v2441_v51  ;;  %v508_v41 = vadd.f32 %v507_v38, %v2435_v43  ;;  %v747_v37 = vmax.f32 %v489_v35, 0.0 }
  0xb4   : > { %v761_v4 = vmax.f32 %v453_v59, 0.0 }
  0xb5   : > { %v762_v13 = vmax.f32 %v472_v63, 0.0  ;;  %v748_v38 = vmax.f32 %v508_v41, 0.0 }
  0xb6   : > { %v810_v34 = vpack.c.bf16 %v761_v4, %v745_v3 }
  0xb7   : > { %v811_v39 = vpack.c.bf16 %v762_v13, %v746_v10 }
  0xb8   : > { %v490_v44 = vpop.f32.mrf.mxu2 }
  0xb9   : > { %v509_v45 = vpop.f32.mrf.mxu3  ;;  %v455_v46 = vpop.f32.mrf.mxu0  ;;  %v491_v19 = vadd.f32 %v490_v44, %v2441_v51 }
  0xba   : > { %v474_v47 = vpop.f32.mrf.mxu1  ;;  %v456_v48 = vadd.f32 %v455_v46, %v2433_v42  ;;  %v510_v30 = vadd.f32 %v509_v45, %v2441_v51 }
  0xbb   : > { %v475_v49 = vadd.f32 %v474_v47, %v2433_v42  ;;  %v2460_v47 = vld [vmem:[%s2810_s3] sm:$0xf]  ;;  %v763_v45 = vmax.f32 %v491_v19, 0.0 }
  0xbc   : > { %v777_v55 = vmax.f32 %v456_v48, 0.0 }
  0xbd   : > { %v778_v60 = vmax.f32 %v475_v49, 0.0  ;;  %v764_v49 = vmax.f32 %v510_v30, 0.0 }
  0xbf   : > { %v813_v58 = vpack.c.bf16 %v764_v49, %v748_v38 }
  0xc0   : > { %v493_v52 = vpop.f32.mrf.mxu2 }
  0xc1   : > { %v512_v53 = vpop.f32.mrf.mxu3  ;;  %v457_v54 = vpop.f32.mrf.mxu0  ;;  %v494_v5 = vadd.f32 %v493_v52, %v2433_v42 }
  0xc2   : > { %v458_v56 = vadd.f32 %v457_v54, %v2439_v50  ;;  %v476_v57 = vpop.f32.mrf.mxu1  ;;  %v513_v15 = vadd.f32 %v512_v53, %v2433_v42 }
  0xc3   : > { %v477_v61 = vadd.f32 %v476_v57, %v2439_v50  ;;  %v779_v28 = vmax.f32 %v494_v5, 0.0 }
  0xc4   : > { %v793_v0 = vmax.f32 %v458_v56, 0.0  ;;  %v780_v46 = vmax.f32 %v513_v15, 0.0  ;;  %v812_v56 = vpack.c.bf16 %v763_v45, %v747_v37 }
  0xc5   : > { %v794_v1 = vmax.f32 %v477_v61, 0.0 }
  0xc6   : > { %v826_v2 = vpack.c.bf16 %v793_v0, %v777_v55 }
  0xc7   : > { %v827_v7 = vpack.c.bf16 %v794_v1, %v778_v60 }
  0xc8   : > { %v495_v18 = vpop.f32.mrf.mxu2  ;;  %858 = vmatpush.bf16.msra.mxu0 %v826_v2 }
  0xc9   : > { %v496_v21 = vadd.f32 %v495_v18, %v2439_v50  ;;  %v514_v23 = vpop.f32.mrf.mxu3  ;;  %871 = vmatpush.bf16.msra.mxu1 %v827_v7  ;;  %v526_v24 = vpop.f32.mrf.mxu0 }
  0xca   : > { %v515_v31 = vadd.f32 %v514_v23, %v2439_v50  ;;  %v545_v33 = vpop.f32.mrf.mxu1  ;;  %v527_v4 = vadd.f32 %v526_v24, %v2435_v43 }
  0xcb   : > { %v795_v36 = vmax.f32 %v496_v21, 0.0  ;;  %v546_v15 = vadd.f32 %v545_v33, %v2435_v43 }
  0xcc   : > { %v796_v44 = vmax.f32 %v515_v31, 0.0  ;;  %859 = vmatpush.bf16.msra.mxu0 %v810_v34  ;;  %v749_v31 = vmax.f32 %v527_v4, 0.0 }
  0xcd   : > { %v828_v48 = vpack.c.bf16 %v795_v36, %v779_v28  ;;  %872 = vmatpush.bf16.msra.mxu1 %v811_v39  ;;  %v750_v28 = vmax.f32 %v546_v15, 0.0 }
  0xce   : > { %v829_v52 = vpack.c.bf16 %v796_v44, %v780_v46 }
  0xcf   : > { %884 = vmatpush.bf16.msra.mxu2 %v828_v48  ;;  %2012 = vmatmul.msk.bf16.vlgmr.msra.gmra.mxu0 %vm848_vm3, %v2460_v47 }
  0xd0   : > { %897 = vmatpush.bf16.msra.mxu3 %v829_v52  ;;  %v564_v53 = vpop.f32.mrf.mxu2  ;;  %2013 = vmatmul.msk.bf16.vlgmr.msra.gmra.mxu1 %vm848_vm3, %v2460_v47 }
  0xd1   : > { %v583_v54 = vpop.f32.mrf.mxu3  ;;  %v528_v55 = vpop.f32.mrf.mxu0 }
  0xd2   : > { %v547_v57 = vpop.f32.mrf.mxu1  ;;  %v529_v5 = vadd.f32 %v528_v55, %v2441_v51  ;;  %v565_v55 = vadd.f32 %v564_v53, %v2435_v43 }
  0xd3   : > { %885 = vmatpush.bf16.msra.mxu2 %v812_v56  ;;  %v548_v18 = vadd.f32 %v547_v57, %v2441_v51 }
  0xd4   : > { %898 = vmatpush.bf16.msra.mxu3 %v813_v58  ;;  %v765_v34 = vmax.f32 %v529_v5, 0.0 }
  0xd5   : > { %v766_v24 = vmax.f32 %v548_v18, 0.0 }
  0xd6   : > { %2014 = vmatmul.msk.bf16.vlgmr.msra.gmra.mxu2 %vm848_vm3, %v2460_v47  ;;  %v814_v38 = vpack.c.bf16 %v765_v34, %v749_v31 }
  0xd7   : > { %2015 = vmatmul.msk.bf16.vlgmr.msra.gmra.mxu3 %vm848_vm3, %v2460_v47  ;;  %v815_v58 = vpack.c.bf16 %v766_v24, %v750_v28 }
  0xd8   : > { %v566_v59 = vpop.f32.mrf.mxu2 }
  0xd9   : > { %v585_v60 = vpop.f32.mrf.mxu3  ;;  %v531_v61 = vpop.f32.mrf.mxu0  ;;  %v567_v33 = vadd.f32 %v566_v59, %v2441_v51 }
  0xda   : > { %v550_v62 = vpop.f32.mrf.mxu1  ;;  %v532_v63 = vadd.f32 %v531_v61, %v2433_v42  ;;  %v586_v49 = vadd.f32 %v585_v60, %v2441_v51  ;;  %v584_v61 = vadd.f32 %v583_v54, %v2435_v43  ;;  %v751_v60 = vmax.f32 %v565_v55, 0.0 }
  0xdb   : > { %v551_v0 = vadd.f32 %v550_v62, %v2433_v42 }
  0xdc   : > { %v781_v7 = vmax.f32 %v532_v63, 0.0  ;;  %v767_v63 = vmax.f32 %v567_v33, 0.0 }
  0xdd   : > { %v782_v19 = vmax.f32 %v551_v0, 0.0 }
  0xde   : > { %v816_v5 = vpack.c.bf16 %v767_v63, %v751_v60 }
  0xe0   : > { %v569_v1 = vpop.f32.mrf.mxu2 }
  0xe1   : > { %v588_v2 = vpop.f32.mrf.mxu3  ;;  %v533_v3 = vpop.f32.mrf.mxu0  ;;  %v570_v36 = vadd.f32 %v569_v1, %v2433_v42  ;;  %v768_v1 = vmax.f32 %v586_v49, 0.0 }
  0xe2   : > { %v534_v10 = vadd.f32 %v533_v3, %v2439_v50  ;;  %v552_v13 = vpop.f32.mrf.mxu1  ;;  %v589_v41 = vadd.f32 %v588_v2, %v2433_v42  ;;  %v752_v3 = vmax.f32 %v584_v61, 0.0 }
  0xe3   : > { %v553_v21 = vadd.f32 %v552_v13, %v2439_v50  ;;  %v783_v56 = vmax.f32 %v570_v36, 0.0 }
  0xe4   : > { %v797_v23 = vmax.f32 %v534_v10, 0.0  ;;  %v784_v62 = vmax.f32 %v589_v41, 0.0  ;;  %v817_v10 = vpack.c.bf16 %v768_v1, %v752_v3 }
  0xe5   : > { %v798_v30 = vmax.f32 %v553_v21, 0.0 }
  0xe6   : > { %v830_v35 = vpack.c.bf16 %v797_v23, %v781_v7 }
  0xe7   : > { %v831_v39 = vpack.c.bf16 %v798_v30, %v782_v19  ;;  %v842_v19 = vld [vmem:[%s2811_s4] sm:$0xff] }
  0xe8   : > { %v571_v46 = vpop.f32.mrf.mxu2  ;;  %910 = vmatpush.bf16.msrb.mxu0 %v830_v35  ;;  %845 = vperm.xlu2 %2150, %v842_v19  }
  0xe9   : > { %v572_v44 = vadd.f32 %v571_v46, %v2439_v50  ;;  %v590_v45 = vpop.f32.mrf.mxu3  ;;  %923 = vmatpush.bf16.msrb.mxu1 %v831_v39  ;;  %v602_v48 = vpop.f32.mrf.mxu0 }
  0xea   : > { %v591_v52 = vadd.f32 %v590_v45, %v2439_v50  ;;  %v621_v37 = vpop.f32.mrf.mxu1  ;;  %v603_v28 = vadd.f32 %v602_v48, %v2435_v43 }
  0xeb   : > { %v799_v57 = vmax.f32 %v572_v44, 0.0  ;;  %v622_v41 = vadd.f32 %v621_v37, %v2435_v43 }
  0xec   : > { %v800_v59 = vmax.f32 %v591_v52, 0.0  ;;  %911 = vmatpush.bf16.msrb.mxu0 %v814_v38  ;;  %v753_v38 = vmax.f32 %v603_v28, 0.0 }
  0xed   : > { %v832_v0 = vpack.c.bf16 %v799_v57, %v783_v56  ;;  %924 = vmatpush.bf16.msrb.mxu1 %v815_v58  ;;  %v754_v57 = vmax.f32 %v622_v41, 0.0 }
  0xee   : > { %v833_v2 = vpack.c.bf16 %v800_v59, %v784_v62 }
  0xef   : > { %936 = vmatpush.bf16.msrb.mxu2 %v832_v0  ;;  %2016 = vmatmul.msk.bf16.vlgmr.msrb.gmra.mxu0 %vm848_vm3, %v2460_v47 }
  0xf0   : > { %949 = vmatpush.bf16.msrb.mxu3 %v833_v2  ;;  %v640_v53 = vpop.f32.mrf.mxu2  ;;  %2017 = vmatmul.msk.bf16.vlgmr.msrb.gmra.mxu1 %vm848_vm3, %v2460_v47 }
  0xf1   : > { %v659_v54 = vpop.f32.mrf.mxu3  ;;  %v604_v4 = vpop.f32.mrf.mxu0 }
  0xf2   : > { %v623_v7 = vpop.f32.mrf.mxu1  ;;  %v605_v24 = vadd.f32 %v604_v4, %v2441_v51  ;;  %v660_v19 = vadd.f32 %v659_v54, %v2435_v43 }
  0xf3   : > { %937 = vmatpush.bf16.msrb.mxu2 %v816_v5  ;;  %v624_v46 = vadd.f32 %v623_v7, %v2441_v51  ;;  %v641_v5 = vadd.f32 %v640_v53, %v2435_v43 }
  0xf4   : > { %950 = vmatpush.bf16.msrb.mxu3 %v817_v10  ;;  %v769_v55 = vmax.f32 %v605_v24, 0.0 }
  0xf5   : > { %v770_v48 = vmax.f32 %v624_v46, 0.0 }
  0xf6   : > { %2018 = vmatmul.msk.bf16.vlgmr.msrb.gmra.mxu2 %vm848_vm3, %v2460_v47  ;;  %v818_v2 = vpack.c.bf16 %v769_v55, %v753_v38 }
  0xf7   : > { %2019 = vmatmul.msk.bf16.vlgmr.msrb.gmra.mxu3 %vm848_vm3, %v2460_v47  ;;  %v819_v7 = vpack.c.bf16 %v770_v48, %v754_v57 }
  0xf8   : > { %v642_v13 = vpop.f32.mrf.mxu2 }
  0xf9   : > { %v661_v15 = vpop.f32.mrf.mxu3  ;;  %v607_v18 = vpop.f32.mrf.mxu0  ;;  %v643_v37 = vadd.f32 %v642_v13, %v2441_v51 }
  0xfa   : > { %v626_v21 = vpop.f32.mrf.mxu1  ;;  %v608_v23 = vadd.f32 %v607_v18, %v2433_v42  ;;  %v662_v60 = vadd.f32 %v661_v15, %v2441_v51  ;;  %v756_v15 = vmax.f32 %v660_v19, 0.0 }
  0xfb   : > { %v627_v31 = vadd.f32 %v626_v21, %v2433_v42 }
  0xfc   : > { %v785_v44 = vmax.f32 %v608_v23, 0.0  ;;  %v771_v23 = vmax.f32 %v643_v37, 0.0 }
  0xfd   : > { %v786_v49 = vmax.f32 %v627_v31, 0.0  ;;  %v772_v31 = vmax.f32 %v662_v60, 0.0 }
 0x100   : > { %v645_v30 = vpop.f32.mrf.mxu2 }
 0x101   : > { %v664_v34 = vpop.f32.mrf.mxu3  ;;  %v609_v35 = vpop.f32.mrf.mxu0  ;;  %v646_v58 = vadd.f32 %v645_v30, %v2433_v42 }
 0x102   : > { %v610_v36 = vadd.f32 %v609_v35, %v2439_v50  ;;  %v628_v39 = vpop.f32.mrf.mxu1  ;;  %v665_v62 = vadd.f32 %v664_v34, %v2433_v42  ;;  %v755_v35 = vmax.f32 %v641_v5, 0.0 }
 0x103   : > { %v629_v33 = vadd.f32 %v628_v39, %v2439_v50  ;;  %v787_v10 = vmax.f32 %v646_v58, 0.0 }
 0x104   : > { %v801_v45 = vmax.f32 %v610_v36, 0.0  ;;  %v788_v21 = vmax.f32 %v665_v62, 0.0  ;;  %v820_v54 = vpack.c.bf16 %v771_v23, %v755_v35  ;;  %v821_v36 = vpack.c.bf16 %v772_v31, %v756_v15 }
 0x105   : > { %v802_v52 = vmax.f32 %v629_v33, 0.0 }
 0x106   : > { %v834_v56 = vpack.c.bf16 %v801_v45, %v785_v44 }
 0x107   : > { %v835_v61 = vpack.c.bf16 %v802_v52, %v786_v49 }
 0x108   : > { %v647_v59 = vpop.f32.mrf.mxu2  ;;  %962 = vmatpush.bf16.msra.mxu0 %v834_v56 }
 0x109   : > { %v648_v63 = vadd.f32 %v647_v59, %v2439_v50  ;;  %v666_v0 = vpop.f32.mrf.mxu3  ;;  %975 = vmatpush.bf16.msra.mxu1 %v835_v61  ;;  %v678_v1 = vpop.f32.mrf.mxu0 }
 0x10a   : > { %v667_v3 = vadd.f32 %v666_v0, %v2439_v50  ;;  %v697_v4 = vpop.f32.mrf.mxu1  ;;  %v679_v62 = vadd.f32 %v678_v1, %v2435_v43 }
 0x10b   : > { %v803_v18 = vmax.f32 %v648_v63, 0.0  ;;  %v698_v63 = vadd.f32 %v697_v4, %v2435_v43 }
 0x10c   : > { %v804_v13 = vmax.f32 %v667_v3, 0.0  ;;  %963 = vmatpush.bf16.msra.mxu0 %v818_v2 }
 0x10d   : > { %v836_v30 = vpack.c.bf16 %v803_v18, %v787_v10  ;;  %976 = vmatpush.bf16.msra.mxu1 %v819_v7  ;;  %v757_v18 = vmax.f32 %v679_v62, 0.0 }
 0x10e   : > { %v837_v34 = vpack.c.bf16 %v804_v13, %v788_v21  ;;  %v758_v13 = vmax.f32 %v698_v63, 0.0 }
 0x10f   : > { %988 = vmatpush.bf16.msra.mxu2 %v836_v30  ;;  %2020 = vmatmul.msk.bf16.vlgmr.msra.gmra.mxu0 %vm848_vm3, %v2460_v47 }
 0x110   : > { %1001 = vmatpush.bf16.msra.mxu3 %v837_v34  ;;  %v716_v53 = vpop.f32.mrf.mxu2  ;;  %2021 = vmatmul.msk.bf16.vlgmr.msra.gmra.mxu1 %vm848_vm3, %v2460_v47 }
 0x111   : > { %v735_v28 = vpop.f32.mrf.mxu3  ;;  %v680_v24 = vpop.f32.mrf.mxu0  ;;  %v717_v35 = vadd.f32 %v716_v53, %v2435_v43 }
 0x112   : > { %v699_v39 = vpop.f32.mrf.mxu1  ;;  %v681_v56 = vadd.f32 %v680_v24, %v2441_v51 }
 0x113   : > { %989 = vmatpush.bf16.msra.mxu2 %v820_v54  ;;  %v700_v58 = vadd.f32 %v699_v39, %v2441_v51 }
 0x114   : > { %1002 = vmatpush.bf16.msra.mxu3 %v821_v36  ;;  %v773_v60 = vmax.f32 %v681_v56, 0.0 }
 0x115   : > { %v774_v5 = vmax.f32 %v700_v58, 0.0 }
 0x116   : > { %2022 = vmatmul.msk.bf16.vlgmr.msra.gmra.mxu2 %vm848_vm3, %v2460_v47  ;;  %v822_v4 = vpack.c.bf16 %v773_v60, %v757_v18 }
 0x117   : > { %2023 = vmatmul.msk.bf16.vlgmr.msra.gmra.mxu3 %vm848_vm3, %v2460_v47  ;;  %v823_v15 = vpack.c.bf16 %v774_v5, %v758_v13 }
 0x118   : > { %v718_v41 = vpop.f32.mrf.mxu2 }
 0x119   : > { %v737_v46 = vpop.f32.mrf.mxu3  ;;  %v683_v33 = vpop.f32.mrf.mxu0  ;;  %v719_v1 = vadd.f32 %v718_v41, %v2441_v51 }
 0x11a   : > { %v702_v44 = vpop.f32.mrf.mxu1  ;;  %v684_v45 = vadd.f32 %v683_v33, %v2433_v42  ;;  %v738_v31 = vadd.f32 %v737_v46, %v2441_v51 }
 0x11b   : > { %v703_v52 = vadd.f32 %v702_v44, %v2433_v42  ;;  %v775_v41 = vmax.f32 %v719_v1, 0.0 }
 0x11c   : > { %v789_v59 = vmax.f32 %v684_v45, 0.0  ;;  %v776_v44 = vmax.f32 %v738_v31, 0.0 }
 0x11d   : > { %v790_v0 = vmax.f32 %v703_v52, 0.0 }
 0x120   : > { %v721_v49 = vpop.f32.mrf.mxu2 }
 0x121   : > { %v740_v38 = vpop.f32.mrf.mxu3  ;;  %v685_v55 = vpop.f32.mrf.mxu0  ;;  %v722_v7 = vadd.f32 %v721_v49, %v2433_v42  ;;  %v759_v49 = vmax.f32 %v717_v35, 0.0 }
 0x122   : > { %v686_v57 = vadd.f32 %v685_v55, %v2439_v50  ;;  %v704_v48 = vpop.f32.mrf.mxu1  ;;  %v741_v19 = vadd.f32 %v740_v38, %v2433_v42  ;;  %v736_v42 = vadd.f32 %v735_v28, %v2435_v43 }
 0x123   : > { %v705_v61 = vadd.f32 %v704_v48, %v2439_v50  ;;  %v791_v54 = vmax.f32 %v722_v7, 0.0  ;;  %v824_v51 = vpack.c.bf16 %v775_v41, %v759_v49 }
 0x124   : > { %v805_v37 = vmax.f32 %v686_v57, 0.0  ;;  %v792_v36 = vmax.f32 %v741_v19, 0.0 }
 0x125   : > { %v806_v2 = vmax.f32 %v705_v61, 0.0 }
 0x126   : > { %v838_v3 = vpack.c.bf16 %v805_v37, %v789_v59 }
 0x127   : > { %v839_v10 = vpack.c.bf16 %v806_v2, %v790_v0  ;;  %v1060_v2 = vlaneseq }
 0x128   : > { %v723_v21 = vpop.f32.mrf.mxu2  ;;  %1014 = vmatpush.bf16.msrb.mxu0 %v838_v3 }
 0x129   : > { %v724_v23 = vadd.f32 %v723_v21, %v2439_v50  ;;  %v742_v30 = vpop.f32.mrf.mxu3  ;;  %1027 = vmatpush.bf16.msrb.mxu1 %v839_v10  ;;  %v2551_v13 = vshrl.u32 %v1060_v2, 7 }
 0x12a   : > { %v743_v34 = vadd.f32 %v742_v30, %v2439_v50  ;;  %v760_v50 = vmax.f32 %v736_v42, 0.0 }
 0x12b   : > { %v807_v24 = vmax.f32 %v724_v23, 0.0 }
 0x12c   : > { %v808_v39 = vmax.f32 %v743_v34, 0.0  ;;  %1015 = vmatpush.bf16.msrb.mxu0 %v822_v4  ;;  %v825_v43 = vpack.c.bf16 %v776_v44, %v760_v50 }
 0x12d   : > { %v840_v33 = vpack.c.bf16 %v807_v24, %v791_v54  ;;  %1028 = vmatpush.bf16.msrb.mxu1 %v823_v15 }
 0x12e   : > { %v841_v45 = vpack.c.bf16 %v808_v39, %v792_v36 }
 0x12f   : > { %1040 = vmatpush.bf16.msrb.mxu2 %v840_v33  ;;  %2024 = vmatmul.msk.bf16.vlgmr.msrb.gmra.mxu0 %vm848_vm3, %v2460_v47 }
 0x130   : > { %1053 = vmatpush.bf16.msrb.mxu3 %v841_v45  ;;  %2025 = vmatmul.msk.bf16.vlgmr.msrb.gmra.mxu1 %vm848_vm3, %v2460_v47 }
 0x133   : > { %1041 = vmatpush.bf16.msrb.mxu2 %v824_v51 }
 0x134   : > { %1054 = vmatpush.bf16.msrb.mxu3 %v825_v43 }
 0x136   : > { %2026 = vmatmul.msk.bf16.vlgmr.msrb.gmra.mxu2 %vm848_vm3, %v2460_v47 }
 0x137   : > { %2027 = vmatmul.msk.bf16.vlgmr.msrb.gmra.mxu3 %vm848_vm3, %v2460_v47 }
 0x142   : > { %v2545_v52 = vpop.permute.xlu2 %845 }
 0x14c   : > { %v861_v53 = vpop.f32.mrf.mxu0 }
 0x14d   : > { %v874_v28 = vpop.f32.mrf.mxu1  ;;  %v862_v55 = vadd.f32 %v861_v53, %v2545_v52 }
 0x14e   : > { %v875_v56 = vadd.f32 %v874_v28, %v2545_v52 }
 0x14f   : > { %v1062_v57 = vrot.slane %v862_v55, 4 }
 0x150   : > { %v1068_v48 = vrot.slane %v875_v56, 4 }
 0x151   : > { %v1063_v61 = vmax.f32 %v862_v55, %v1062_v57 }
 0x152   : > { %v1069_v62 = vmax.f32 %v875_v56, %v1068_v48 }
 0x153   : > { %v1064_v63 = vrot.slane %v1063_v61, 2 }
 0x154   : > { %v863_v46 = vpop.f32.mrf.mxu0  ;;  %v1070_v47 = vrot.slane %v1069_v62, 2 }
 0x155   : > { %v876_v38 = vpop.f32.mrf.mxu1  ;;  %v1065_v3 = vmax.f32 %v1063_v61, %v1064_v63 }
 0x156   : > { %v1071_v5 = vmax.f32 %v1069_v62, %v1070_v47 }
 0x157   : > { %v1066_v18 = vrot.slane %v1065_v3, 1 }
 0x158   : > { %v1072_v19 = vrot.slane %v1071_v5, 1 }
 0x159   : > { %v887_v58 = vpop.f32.mrf.mxu2  ;;  %v1067_v30 = vmax.f32 %v1065_v3, %v1066_v18 }
 0x15a   : > { %v900_v59 = vpop.f32.mrf.mxu3  ;;  %v888_v37 = vadd.f32 %v887_v58, %v2545_v52  ;;  %v1073_v4 = vmax.f32 %v1071_v5, %v1072_v19 }
 0x15b   : > { %v901_v0 = vadd.f32 %v900_v59, %v2545_v52  ;;  %vm1158_vm4 = vcmp.ge.f32.partialorder %v862_v55, %v1067_v30 }
 0x15c   : > { %v1074_v60 = vrot.slane %v888_v37, 4  ;;  %vm1159_vm5 = vcmp.ge.f32.partialorder %v875_v56, %v1073_v4  ;;  %v1174_v54 = vsel %vm1158_vm4, %v2551_v13, 8 }
 0x15d   : > { %v1080_v7 = vrot.slane %v901_v0, 4  ;;  %v1175_v24 = vsel %vm1159_vm5, %v2551_v13, 8  ;;  %v1190_v36 = vrot.slane %v1174_v54, 4  ;;  %vm1403_vm5 = vcmask 1043456  }
 0x15e   : > { %v1075_v10 = vmax.f32 %v888_v37, %v1074_v60  ;;  %v1199_v39 = vrot.slane %v1175_v24, 4 }
 0x15f   : > { %v1081_v21 = vmax.f32 %v901_v0, %v1080_v7  ;;  %vm1191_vm6 = vcmp.lt.s32.totalorder %v1174_v54, %v1190_v36  ;;  %v2217_v7 = vmov 0.0  }
 0x160   : > { %v1076_v1 = vrot.slane %v1075_v10, 2  ;;  %vm1200_vm7 = vcmp.lt.s32.totalorder %v1175_v24, %v1199_v39  ;;  %v1192_v45 = vsel %vm1191_vm6, %v1174_v54, %v1190_v36 }
 0x161   : > { %v889_v23 = vpop.f32.mrf.mxu2  ;;  %v1082_v31 = vrot.slane %v1081_v21, 2  ;;  %v1201_v49 = vsel %vm1200_vm7, %v1175_v24, %v1199_v39  ;;  %v1193_v50 = vrot.slane %v1192_v45, 2 }
 0x162   : > { %v902_v34 = vpop.f32.mrf.mxu3  ;;  %v1077_v35 = vmax.f32 %v1075_v10, %v1076_v1  ;;  %v1202_v51 = vrot.slane %v1201_v49, 2 }
 0x163   : > { %v1083_v15 = vmax.f32 %v1081_v21, %v1082_v31  ;;  %vm1194_vm10 = vcmp.lt.s32.totalorder %v1192_v45, %v1193_v50 }
 0x164   : > { %v1078_v42 = vrot.slane %v1077_v35, 1  ;;  %vm1203_vm11 = vcmp.lt.s32.totalorder %v1201_v49, %v1202_v51  ;;  %v1195_v55 = vsel %vm1194_vm10, %v1192_v45, %v1193_v50 }
 0x165   : > { %v1084_v41 = vrot.slane %v1083_v15, 1  ;;  %v1204_v56 = vsel %vm1203_vm11, %v1201_v49, %v1202_v51  ;;  %v1196_v58 = vrot.slane %v1195_v55, 1 }
 0x166   : > { %v1079_v33 = vmax.f32 %v1077_v35, %v1078_v42  ;;  %v1205_v61 = vrot.slane %v1204_v56, 1 }
 0x167   : > { %v1085_v44 = vmax.f32 %v1083_v15, %v1084_v41  ;;  %vm1197_vm14 = vcmp.lt.s32.totalorder %v1195_v55, %v1196_v58 }
 0x168   : > { %vm1160_vm8 = vcmp.ge.f32.partialorder %v888_v37, %v1079_v33  ;;  %vm1206_vm15 = vcmp.lt.s32.totalorder %v1204_v56, %v1205_v61  ;;  %v1198_v2 = vsel %vm1197_vm14, %v1195_v55, %v1196_v58 }
 0x169   : > { %v1176_v43 = vsel %vm1160_vm8, %v2551_v13, 8  ;;  %vm1161_vm9 = vcmp.ge.f32.partialorder %v901_v0, %v1085_v44  ;;  %v1207_v60 = vsel %vm1206_vm15, %v1204_v56, %v1205_v61  ;;  %vm1334_vm3 = vcmp.eq.s32.totalorder %v2551_v13, %v1198_v2 }
 0x16a   : > { %v1208_v53 = vrot.slane %v1176_v43, 4  ;;  %v1177_v28 = vsel %vm1161_vm9, %v2551_v13, 8  ;;  %vm1335_vm4 = vcmp.eq.s32.totalorder %v2551_v13, %v1207_v60  ;;  %v2028_v10 = vsel %vm1334_vm3, 1.0, %v2217_v7 }
 0x16b   : > { %v1217_v46 = vrot.slane %v1177_v28, 4  ;;  %v2029_v18 = vsel %vm1335_vm4, 1.0, %v2217_v7  ;;  %v1382_v1 = vpack.c.bf16 %v2028_v10, %v2028_v10 }
 0x16c   : > { %v913_v38 = vpop.f32.mrf.mxu0  ;;  %vm1209_vm12 = vcmp.lt.s32.totalorder %v1176_v43, %v1208_v53  ;;  %v1383_v23 = vpack.c.bf16 %v2029_v18, %v2029_v18 }
 0x16d   : > { %v914_v57 = vadd.f32 %v913_v38, %v2545_v52  ;;  %v926_v48 = vpop.f32.mrf.mxu1  ;;  %v1210_v62 = vsel %vm1209_vm12, %v1176_v43, %v1208_v53  ;;  %vm1218_vm13 = vcmp.lt.s32.totalorder %v1177_v28, %v1217_v46  ;;  %v1405_v54 = vsel %vm1403_vm5, %v1382_v1, 0 }
 0x16e   : > { %v927_v59 = vadd.f32 %v926_v48, %v2545_v52  ;;  %v1211_v37 = vrot.slane %v1210_v62, 2  ;;  %v1219_v47 = vsel %vm1218_vm13, %v1177_v28, %v1217_v46  ;;  %v1408_v24 = vsel %vm1403_vm5, %v1383_v23, 0  ;;  %1459 = vmatpush.bf16.msra.mxu0 %v1405_v54 }
 0x16f   : > { %v1086_v63 = vrot.slane %v914_v57, 4  ;;  %v1220_v34 = vrot.slane %v1219_v47, 2  ;;  %1472 = vmatpush.bf16.msra.mxu1 %v1408_v24  ;;  %vm1399_vm13 = vcmask 64512  }
 0x170   : > { %v1092_v0 = vrot.slane %v927_v59, 4  ;;  %vm1212_vm2 = vcmp.lt.s32.totalorder %v1210_v62, %v1211_v37 }
 0x171   : > { %v1087_v3 = vmax.f32 %v914_v57, %v1086_v63  ;;  %v1213_v19 = vsel %vm1212_vm2, %v1210_v62, %v1211_v37  ;;  %vm1221_vm7 = vcmp.lt.s32.totalorder %v1219_v47, %v1220_v34 }
 0x172   : > { %v1093_v5 = vmax.f32 %v927_v59, %v1092_v0  ;;  %v1214_v30 = vrot.slane %v1213_v19, 1  ;;  %v1222_v41 = vsel %vm1221_vm7, %v1219_v47, %v1220_v34  ;;  %v2577_v0 = vld [vmem:[%s2812_s5] sm:$0x3] }
 0x173   : > { %v1088_v21 = vrot.slane %v1087_v3, 2  ;;  %v1223_v45 = vrot.slane %v1222_v41, 1  ;;  %2045 = vmatmul.msk.bf16.vlgmr.msra.gmra.mxu1 %vm1399_vm13, %v2577_v0  ;;  %2044 = vmatmul.msk.bf16.vlgmr.msra.gmra.mxu0 %vm1399_vm13, %v2577_v0 }
 0x174   : > { %v1094_v4 = vrot.slane %v1093_v5, 2  ;;  %v915_v31 = vpop.f32.mrf.mxu0  ;;  %vm1215_vm6 = vcmp.lt.s32.totalorder %v1213_v19, %v1214_v30 }
 0x175   : > { %v1089_v35 = vmax.f32 %v1087_v3, %v1088_v21  ;;  %v928_v15 = vpop.f32.mrf.mxu1  ;;  %v1216_v36 = vsel %vm1215_vm6, %v1213_v19, %v1214_v30  ;;  %vm1224_vm9 = vcmp.lt.s32.totalorder %v1222_v41, %v1223_v45 }
 0x176   : > { %v1095_v42 = vmax.f32 %v1093_v5, %v1094_v4  ;;  %vm1336_vm8 = vcmp.eq.s32.totalorder %v2551_v13, %v1216_v36  ;;  %v1225_v55 = vsel %vm1224_vm9, %v1222_v41, %v1223_v45 }
 0x177   : > { %v1090_v39 = vrot.slane %v1089_v35, 1  ;;  %v2030_v44 = vsel %vm1336_vm8, 1.0, %v2217_v7  ;;  %vm1337_vm12 = vcmp.eq.s32.totalorder %v2551_v13, %v1225_v55 }
 0x178   : > { %v1096_v33 = vrot.slane %v1095_v42, 1  ;;  %v1384_v51 = vpack.c.bf16 %v2030_v44, %v2030_v44  ;;  %v2031_v37 = vsel %vm1337_vm12, 1.0, %v2217_v7 }
 0x179   : > { %v1091_v49 = vmax.f32 %v1089_v35, %v1090_v39  ;;  %v939_v50 = vpop.f32.mrf.mxu2  ;;  %v1385_v47 = vpack.c.bf16 %v2031_v37, %v2031_v37 }
 0x17a   : > { %v1097_v43 = vmax.f32 %v1095_v42, %v1096_v33  ;;  %v940_v53 = vadd.f32 %v939_v50, %v2545_v52  ;;  %v952_v28 = vpop.f32.mrf.mxu3  ;;  %v1411_v38 = vsel %vm1403_vm5, %v1384_v51, 0 }
 0x17b   : > { %vm1162_vm10 = vcmp.ge.f32.partialorder %v914_v57, %v1091_v49  ;;  %v953_v46 = vadd.f32 %v952_v28, %v2545_v52  ;;  %1485 = vmatpush.bf16.msra.mxu2 %v1411_v38  ;;  %v1414_v3 = vsel %vm1403_vm5, %v1385_v47, 0 }
 0x17c   : > { %v1178_v56 = vsel %vm1162_vm10, %v2551_v13, 8  ;;  %vm1163_vm11 = vcmp.ge.f32.partialorder %v927_v59, %v1097_v43  ;;  %v1098_v48 = vrot.slane %v940_v53, 4  ;;  %1498 = vmatpush.bf16.msra.mxu3 %v1414_v3 }
 0x17d   : > { %v1226_v58 = vrot.slane %v1178_v56, 4  ;;  %v1179_v61 = vsel %vm1163_vm11, %v2551_v13, 8  ;;  %v1104_v62 = vrot.slane %v953_v46, 4 }
 0x17e   : > { %v1235_v63 = vrot.slane %v1179_v61, 4  ;;  %v1099_v57 = vmax.f32 %v940_v53, %v1098_v48  ;;  %2046 = vmatmul.msk.bf16.vlgmr.msra.gmra.mxu2 %vm1399_vm13, %v2577_v0 }
 0x17f   : > { %vm1227_vm14 = vcmp.lt.s32.totalorder %v1178_v56, %v1226_v58  ;;  %v1105_v59 = vmax.f32 %v953_v46, %v1104_v62  ;;  %2047 = vmatmul.msk.bf16.vlgmr.msra.gmra.mxu3 %vm1399_vm13, %v2577_v0 }
 0x180   : > { %v1228_v2 = vsel %vm1227_vm14, %v1178_v56, %v1226_v58  ;;  %vm1236_vm15 = vcmp.lt.s32.totalorder %v1179_v61, %v1235_v63  ;;  %v1100_v60 = vrot.slane %v1099_v57, 2 }
 0x181   : > { %v1229_v5 = vrot.slane %v1228_v2, 2  ;;  %v1237_v10 = vsel %vm1236_vm15, %v1179_v61, %v1235_v63  ;;  %v1106_v18 = vrot.slane %v1105_v59, 2  ;;  %v941_v19 = vpop.f32.mrf.mxu2 }
 0x182   : > { %v1238_v21 = vrot.slane %v1237_v10, 2  ;;  %v1101_v1 = vmax.f32 %v1099_v57, %v1100_v60  ;;  %v954_v23 = vpop.f32.mrf.mxu3 }
 0x183   : > { %vm1230_vm2 = vcmp.lt.s32.totalorder %v1228_v2, %v1229_v5  ;;  %v1107_v30 = vmax.f32 %v1105_v59, %v1106_v18 }
 0x184   : > { %vm1239_vm3 = vcmp.lt.s32.totalorder %v1237_v10, %v1238_v21  ;;  %v1102_v4 = vrot.slane %v1101_v1, 1  ;;  %v1231_v31 = vsel %vm1230_vm2, %v1228_v2, %v1229_v5 }
 0x185   : > { %v1108_v34 = vrot.slane %v1107_v30, 1  ;;  %v1232_v35 = vrot.slane %v1231_v31, 1  ;;  %v1240_v15 = vsel %vm1239_vm3, %v1237_v10, %v1238_v21 }
 0x186   : > { %v1103_v54 = vmax.f32 %v1101_v1, %v1102_v4  ;;  %v1241_v24 = vrot.slane %v1240_v15, 1 }
 0x187   : > { %v1109_v42 = vmax.f32 %v1107_v30, %v1108_v34  ;;  %vm1233_vm4 = vcmp.lt.s32.totalorder %v1231_v31, %v1232_v35 }
 0x188   : > { %vm1164_vm6 = vcmp.ge.f32.partialorder %v940_v53, %v1103_v54  ;;  %v1234_v36 = vsel %vm1233_vm4, %v1231_v31, %v1232_v35  ;;  %vm1242_vm7 = vcmp.lt.s32.totalorder %v1240_v15, %v1241_v24 }
 0x189   : > { %v1180_v39 = vsel %vm1164_vm6, %v2551_v13, 8  ;;  %vm1165_vm8 = vcmp.ge.f32.partialorder %v953_v46, %v1109_v42  ;;  %vm1338_vm9 = vcmp.eq.s32.totalorder %v2551_v13, %v1234_v36  ;;  %v1243_v41 = vsel %vm1242_vm7, %v1240_v15, %v1241_v24 }
 0x18a   : > { %v1244_v33 = vrot.slane %v1180_v39, 4  ;;  %v1181_v44 = vsel %vm1165_vm8, %v2551_v13, 8  ;;  %v2032_v45 = vsel %vm1338_vm9, 1.0, %v2217_v7  ;;  %vm1339_vm10 = vcmp.eq.s32.totalorder %v2551_v13, %v1243_v41 }
 0x18b   : > { %v1253_v49 = vrot.slane %v1181_v44, 4  ;;  %v1386_v50 = vpack.c.bf16 %v2032_v45, %v2032_v45  ;;  %v2033_v51 = vsel %vm1339_vm10, 1.0, %v2217_v7 }
 0x18c   : > { %vm1245_vm11 = vcmp.lt.s32.totalorder %v1180_v39, %v1244_v33  ;;  %v965_v43 = vpop.f32.mrf.mxu0  ;;  %v1387_v53 = vpack.c.bf16 %v2033_v51, %v2033_v51 }
 0x18d   : > { %v1246_v28 = vsel %vm1245_vm11, %v1180_v39, %v1244_v33  ;;  %vm1254_vm12 = vcmp.lt.s32.totalorder %v1181_v44, %v1253_v49  ;;  %v966_v46 = vadd.f32 %v965_v43, %v2545_v52  ;;  %v978_v38 = vpop.f32.mrf.mxu1  ;;  %v1417_v55 = vsel %vm1403_vm5, %v1386_v50, 0 }
 0x18e   : > { %v1247_v56 = vrot.slane %v1246_v28, 2  ;;  %v1255_v48 = vsel %vm1254_vm12, %v1181_v44, %v1253_v49  ;;  %v979_v58 = vadd.f32 %v978_v38, %v2545_v52  ;;  %1511 = vmatpush.bf16.msrb.mxu0 %v1417_v55  ;;  %v1420_v61 = vsel %vm1403_vm5, %v1387_v53, 0 }
 0x18f   : > { %v1256_v62 = vrot.slane %v1255_v48, 2  ;;  %v1110_v37 = vrot.slane %v966_v46, 4  ;;  %1524 = vmatpush.bf16.msrb.mxu1 %v1420_v61 }
 0x190   : > { %vm1248_vm14 = vcmp.lt.s32.totalorder %v1246_v28, %v1247_v56  ;;  %v1116_v63 = vrot.slane %v979_v58, 4 }
 0x191   : > { %vm1257_vm15 = vcmp.lt.s32.totalorder %v1255_v48, %v1256_v62  ;;  %v1111_v57 = vmax.f32 %v966_v46, %v1110_v37  ;;  %v1249_v47 = vsel %vm1248_vm14, %v1246_v28, %v1247_v56  ;;  %2048 = vmatmul.msk.bf16.vlgmr.msrb.gmra.mxu0 %vm1399_vm13, %v2577_v0 }
 0x192   : > { %v1117_v59 = vmax.f32 %v979_v58, %v1116_v63  ;;  %v1250_v2 = vrot.slane %v1249_v47, 1  ;;  %v1258_v60 = vsel %vm1257_vm15, %v1255_v48, %v1256_v62  ;;  %2049 = vmatmul.msk.bf16.vlgmr.msrb.gmra.mxu1 %vm1399_vm13, %v2577_v0 }
 0x193   : > { %v1112_v3 = vrot.slane %v1111_v57, 2  ;;  %v1259_v5 = vrot.slane %v1258_v60, 1 }
 0x194   : > { %v1118_v10 = vrot.slane %v1117_v59, 2  ;;  %vm1251_vm2 = vcmp.lt.s32.totalorder %v1249_v47, %v1250_v2  ;;  %v967_v18 = vpop.f32.mrf.mxu0 }
 0x195   : > { %v1113_v19 = vmax.f32 %v1111_v57, %v1112_v3  ;;  %v1252_v21 = vsel %vm1251_vm2, %v1249_v47, %v1250_v2  ;;  %vm1260_vm3 = vcmp.lt.s32.totalorder %v1258_v60, %v1259_v5  ;;  %v980_v1 = vpop.f32.mrf.mxu1 }
 0x196   : > { %v1119_v23 = vmax.f32 %v1117_v59, %v1118_v10  ;;  %vm1340_vm4 = vcmp.eq.s32.totalorder %v2551_v13, %v1252_v21  ;;  %v1261_v30 = vsel %vm1260_vm3, %v1258_v60, %v1259_v5 }
 0x197   : > { %v1114_v4 = vrot.slane %v1113_v19, 1  ;;  %v2034_v31 = vsel %vm1340_vm4, 1.0, %v2217_v7  ;;  %vm1341_vm6 = vcmp.eq.s32.totalorder %v2551_v13, %v1261_v30 }
 0x198   : > { %v1120_v34 = vrot.slane %v1119_v23, 1  ;;  %v1388_v35 = vpack.c.bf16 %v2034_v31, %v2034_v31  ;;  %v2035_v15 = vsel %vm1341_vm6, 1.0, %v2217_v7 }
 0x199   : > { %v1115_v54 = vmax.f32 %v1113_v19, %v1114_v4  ;;  %v991_v24 = vpop.f32.mrf.mxu2  ;;  %v1389_v42 = vpack.c.bf16 %v2035_v15, %v2035_v15 }
 0x19a   : > { %v1121_v36 = vmax.f32 %v1119_v23, %v1120_v34  ;;  %v992_v39 = vadd.f32 %v991_v24, %v2545_v52  ;;  %v1004_v41 = vpop.f32.mrf.mxu3  ;;  %v1423_v33 = vsel %vm1403_vm5, %v1388_v35, 0 }
 0x19b   : > { %vm1166_vm7 = vcmp.ge.f32.partialorder %v966_v46, %v1115_v54  ;;  %v1005_v44 = vadd.f32 %v1004_v41, %v2545_v52  ;;  %1537 = vmatpush.bf16.msrb.mxu2 %v1423_v33  ;;  %v1426_v45 = vsel %vm1403_vm5, %v1389_v42, 0 }
 0x19c   : > { %v1182_v49 = vsel %vm1166_vm7, %v2551_v13, 8  ;;  %vm1167_vm8 = vcmp.ge.f32.partialorder %v979_v58, %v1121_v36  ;;  %v1122_v50 = vrot.slane %v992_v39, 4  ;;  %1550 = vmatpush.bf16.msrb.mxu3 %v1426_v45 }
 0x19d   : > { %v1262_v51 = vrot.slane %v1182_v49, 4  ;;  %v1183_v43 = vsel %vm1167_vm8, %v2551_v13, 8  ;;  %v1128_v53 = vrot.slane %v1005_v44, 4 }
 0x19e   : > { %v1271_v28 = vrot.slane %v1183_v43, 4  ;;  %v1123_v38 = vmax.f32 %v992_v39, %v1122_v50  ;;  %2050 = vmatmul.msk.bf16.vlgmr.msrb.gmra.mxu2 %vm1399_vm13, %v2577_v0 }
 0x19f   : > { %vm1263_vm9 = vcmp.lt.s32.totalorder %v1182_v49, %v1262_v51  ;;  %v1129_v46 = vmax.f32 %v1005_v44, %v1128_v53  ;;  %2051 = vmatmul.msk.bf16.vlgmr.msrb.gmra.mxu3 %vm1399_vm13, %v2577_v0 }
 0x1a0   : > { %v1264_v55 = vsel %vm1263_vm9, %v1182_v49, %v1262_v51  ;;  %vm1272_vm10 = vcmp.lt.s32.totalorder %v1183_v43, %v1271_v28  ;;  %v1124_v56 = vrot.slane %v1123_v38, 2 }
 0x1a1   : > { %v1265_v48 = vrot.slane %v1264_v55, 2  ;;  %v1273_v58 = vsel %vm1272_vm10, %v1183_v43, %v1271_v28  ;;  %v1130_v61 = vrot.slane %v1129_v46, 2  ;;  %v993_v62 = vpop.f32.mrf.mxu2 }
 0x1a2   : > { %v1274_v37 = vrot.slane %v1273_v58, 2  ;;  %v1125_v63 = vmax.f32 %v1123_v38, %v1124_v56  ;;  %v1006_v57 = vpop.f32.mrf.mxu3 }
 0x1a3   : > { %vm1266_vm11 = vcmp.lt.s32.totalorder %v1264_v55, %v1265_v48  ;;  %v1131_v47 = vmax.f32 %v1129_v46, %v1130_v61 }
 0x1a4   : > { %vm1275_vm12 = vcmp.lt.s32.totalorder %v1273_v58, %v1274_v37  ;;  %v1126_v59 = vrot.slane %v1125_v63, 1  ;;  %v1267_v2 = vsel %vm1266_vm11, %v1264_v55, %v1265_v48 }
 0x1a5   : > { %v1132_v60 = vrot.slane %v1131_v47, 1  ;;  %v1268_v3 = vrot.slane %v1267_v2, 1  ;;  %v1276_v5 = vsel %vm1275_vm12, %v1273_v58, %v1274_v37 }
 0x1a6   : > { %v1127_v10 = vmax.f32 %v1125_v63, %v1126_v59  ;;  %v1277_v18 = vrot.slane %v1276_v5, 1 }
 0x1a7   : > { %v1133_v19 = vmax.f32 %v1131_v47, %v1132_v60  ;;  %vm1269_vm14 = vcmp.lt.s32.totalorder %v1267_v2, %v1268_v3 }
 0x1a8   : > { %vm1168_vm15 = vcmp.ge.f32.partialorder %v992_v39, %v1127_v10  ;;  %v1270_v21 = vsel %vm1269_vm14, %v1267_v2, %v1268_v3  ;;  %vm1278_vm2 = vcmp.lt.s32.totalorder %v1276_v5, %v1277_v18 }
 0x1a9   : > { %v1184_v1 = vsel %vm1168_vm15, %v2551_v13, 8  ;;  %vm1169_vm3 = vcmp.ge.f32.partialorder %v1005_v44, %v1133_v19  ;;  %vm1342_vm4 = vcmp.eq.s32.totalorder %v2551_v13, %v1270_v21  ;;  %v1279_v23 = vsel %vm1278_vm2, %v1276_v5, %v1277_v18 }
 0x1aa   : > { %v1280_v30 = vrot.slane %v1184_v1, 4  ;;  %v1185_v4 = vsel %vm1169_vm3, %v2551_v13, 8  ;;  %v2036_v31 = vsel %vm1342_vm4, 1.0, %v2217_v7  ;;  %vm1343_vm6 = vcmp.eq.s32.totalorder %v2551_v13, %v1279_v23 }
 0x1ab   : > { %v1289_v34 = vrot.slane %v1185_v4, 4  ;;  %v1390_v35 = vpack.c.bf16 %v2036_v31, %v2036_v31  ;;  %v2037_v15 = vsel %vm1343_vm6, 1.0, %v2217_v7 }
 0x1ac   : > { %vm1281_vm7 = vcmp.lt.s32.totalorder %v1184_v1, %v1280_v30  ;;  %v1017_v54 = vpop.f32.mrf.mxu0  ;;  %v1391_v24 = vpack.c.bf16 %v2037_v15, %v2037_v15 }
 0x1ad   : > { %v1282_v42 = vsel %vm1281_vm7, %v1184_v1, %v1280_v30  ;;  %vm1290_vm8 = vcmp.lt.s32.totalorder %v1185_v4, %v1289_v34  ;;  %v1018_v36 = vadd.f32 %v1017_v54, %v2545_v52  ;;  %v1030_v39 = vpop.f32.mrf.mxu1  ;;  %v1429_v41 = vsel %vm1403_vm5, %v1390_v35, 0 }
 0x1ae   : > { %v1283_v33 = vrot.slane %v1282_v42, 2  ;;  %v1291_v44 = vsel %vm1290_vm8, %v1185_v4, %v1289_v34  ;;  %v1031_v45 = vadd.f32 %v1030_v39, %v2545_v52  ;;  %1563 = vmatpush.bf16.msra.mxu0 %v1429_v41  ;;  %v1432_v49 = vsel %vm1403_vm5, %v1391_v24, 0 }
 0x1af   : > { %v1292_v50 = vrot.slane %v1291_v44, 2  ;;  %v1134_v51 = vrot.slane %v1018_v36, 4  ;;  %1576 = vmatpush.bf16.msra.mxu1 %v1432_v49 }
 0x1b0   : > { %vm1284_vm9 = vcmp.lt.s32.totalorder %v1282_v42, %v1283_v33  ;;  %v1140_v43 = vrot.slane %v1031_v45, 4 }
 0x1b1   : > { %vm1293_vm10 = vcmp.lt.s32.totalorder %v1291_v44, %v1292_v50  ;;  %v1135_v53 = vmax.f32 %v1018_v36, %v1134_v51  ;;  %v1285_v28 = vsel %vm1284_vm9, %v1282_v42, %v1283_v33  ;;  %2052 = vmatmul.msk.bf16.vlgmr.msra.gmra.mxu0 %vm1399_vm13, %v2577_v0 }
 0x1b2   : > { %v1141_v38 = vmax.f32 %v1031_v45, %v1140_v43  ;;  %v1286_v46 = vrot.slane %v1285_v28, 1  ;;  %v1294_v55 = vsel %vm1293_vm10, %v1291_v44, %v1292_v50  ;;  %2053 = vmatmul.msk.bf16.vlgmr.msra.gmra.mxu1 %vm1399_vm13, %v2577_v0 }
 0x1b3   : > { %v1136_v56 = vrot.slane %v1135_v53, 2  ;;  %v1295_v48 = vrot.slane %v1294_v55, 1 }
 0x1b4   : > { %v1142_v58 = vrot.slane %v1141_v38, 2  ;;  %vm1287_vm11 = vcmp.lt.s32.totalorder %v1285_v28, %v1286_v46  ;;  %v1019_v61 = vpop.f32.mrf.mxu0 }
 0x1b5   : > { %v1137_v62 = vmax.f32 %v1135_v53, %v1136_v56  ;;  %v1288_v37 = vsel %vm1287_vm11, %v1285_v28, %v1286_v46  ;;  %vm1296_vm12 = vcmp.lt.s32.totalorder %v1294_v55, %v1295_v48  ;;  %v1032_v63 = vpop.f32.mrf.mxu1 }
 0x1b6   : > { %v1143_v57 = vmax.f32 %v1141_v38, %v1142_v58  ;;  %vm1344_vm14 = vcmp.eq.s32.totalorder %v2551_v13, %v1288_v37  ;;  %v1297_v47 = vsel %vm1296_vm12, %v1294_v55, %v1295_v48 }
 0x1b7   : > { %v1138_v59 = vrot.slane %v1137_v62, 1  ;;  %v2038_v2 = vsel %vm1344_vm14, 1.0, %v2217_v7  ;;  %vm1345_vm15 = vcmp.eq.s32.totalorder %v2551_v13, %v1297_v47 }
 0x1b8   : > { %v1144_v60 = vrot.slane %v1143_v57, 1  ;;  %v1392_v3 = vpack.c.bf16 %v2038_v2, %v2038_v2  ;;  %v2039_v5 = vsel %vm1345_vm15, 1.0, %v2217_v7 }
 0x1b9   : > { %v1139_v10 = vmax.f32 %v1137_v62, %v1138_v59  ;;  %v1043_v18 = vpop.f32.mrf.mxu2  ;;  %v1393_v19 = vpack.c.bf16 %v2039_v5, %v2039_v5 }
 0x1ba   : > { %v1145_v21 = vmax.f32 %v1143_v57, %v1144_v60  ;;  %v1044_v1 = vadd.f32 %v1043_v18, %v2545_v52  ;;  %v1056_v23 = vpop.f32.mrf.mxu3  ;;  %v1435_v30 = vsel %vm1403_vm5, %v1392_v3, 0 }
 0x1bb   : > { %vm1170_vm2 = vcmp.ge.f32.partialorder %v1018_v36, %v1139_v10  ;;  %v1057_v4 = vadd.f32 %v1056_v23, %v2545_v52  ;;  %1589 = vmatpush.bf16.msra.mxu2 %v1435_v30  ;;  %v1438_v31 = vsel %vm1403_vm5, %v1393_v19, 0 }
 0x1bc   : > { %v1186_v34 = vsel %vm1170_vm2, %v2551_v13, 8  ;;  %vm1171_vm3 = vcmp.ge.f32.partialorder %v1031_v45, %v1145_v21  ;;  %v1146_v35 = vrot.slane %v1044_v1, 4  ;;  %1602 = vmatpush.bf16.msra.mxu3 %v1438_v31 }
 0x1bd   : > { %v1298_v15 = vrot.slane %v1186_v34, 4  ;;  %v1187_v54 = vsel %vm1171_vm3, %v2551_v13, 8  ;;  %v1152_v24 = vrot.slane %v1057_v4, 4 }
 0x1be   : > { %v1307_v42 = vrot.slane %v1187_v54, 4  ;;  %v1147_v39 = vmax.f32 %v1044_v1, %v1146_v35  ;;  %2054 = vmatmul.msk.bf16.vlgmr.msra.gmra.mxu2 %vm1399_vm13, %v2577_v0 }
 0x1bf   : > { %vm1299_vm4 = vcmp.lt.s32.totalorder %v1186_v34, %v1298_v15  ;;  %v1153_v36 = vmax.f32 %v1057_v4, %v1152_v24  ;;  %2055 = vmatmul.msk.bf16.vlgmr.msra.gmra.mxu3 %vm1399_vm13, %v2577_v0 }
 0x1c0   : > { %v1300_v52 = vsel %vm1299_vm4, %v1186_v34, %v1298_v15  ;;  %vm1308_vm6 = vcmp.lt.s32.totalorder %v1187_v54, %v1307_v42  ;;  %v1148_v41 = vrot.slane %v1147_v39, 2 }
 0x1c1   : > { %v1301_v33 = vrot.slane %v1300_v52, 2  ;;  %v1309_v44 = vsel %vm1308_vm6, %v1187_v54, %v1307_v42  ;;  %v1154_v45 = vrot.slane %v1153_v36, 2  ;;  %v1045_v49 = vpop.f32.mrf.mxu2 }
 0x1c2   : > { %v1310_v50 = vrot.slane %v1309_v44, 2  ;;  %v1149_v51 = vmax.f32 %v1147_v39, %v1148_v41  ;;  %v1058_v43 = vpop.f32.mrf.mxu3 }
 0x1c3   : > { %vm1302_vm7 = vcmp.lt.s32.totalorder %v1300_v52, %v1301_v33  ;;  %v1155_v53 = vmax.f32 %v1153_v36, %v1154_v45 }
 0x1c4   : > { %vm1311_vm8 = vcmp.lt.s32.totalorder %v1309_v44, %v1310_v50  ;;  %v1150_v28 = vrot.slane %v1149_v51, 1  ;;  %v1303_v38 = vsel %vm1302_vm7, %v1300_v52, %v1301_v33 }
 0x1c5   : > { %v1156_v46 = vrot.slane %v1155_v53, 1  ;;  %v1304_v55 = vrot.slane %v1303_v38, 1  ;;  %v1312_v56 = vsel %vm1311_vm8, %v1309_v44, %v1310_v50 }
 0x1c6   : > { %v1151_v48 = vmax.f32 %v1149_v51, %v1150_v28  ;;  %v1313_v58 = vrot.slane %v1312_v56, 1 }
 0x1c7   : > { %v1157_v61 = vmax.f32 %v1155_v53, %v1156_v46  ;;  %vm1305_vm9 = vcmp.lt.s32.totalorder %v1303_v38, %v1304_v55 }
 0x1c8   : > { %vm1172_vm10 = vcmp.ge.f32.partialorder %v1044_v1, %v1151_v48  ;;  %v1306_v62 = vsel %vm1305_vm9, %v1303_v38, %v1304_v55  ;;  %vm1314_vm11 = vcmp.lt.s32.totalorder %v1312_v56, %v1313_v58 }
 0x1c9   : > { %v1188_v37 = vsel %vm1172_vm10, %v2551_v13, 8  ;;  %vm1173_vm12 = vcmp.ge.f32.partialorder %v1057_v4, %v1157_v61  ;;  %vm1346_vm14 = vcmp.eq.s32.totalorder %v2551_v13, %v1306_v62  ;;  %v1315_v63 = vsel %vm1314_vm11, %v1312_v56, %v1313_v58 }
 0x1ca   : > { %v1316_v57 = vrot.slane %v1188_v37, 4  ;;  %v1189_v47 = vsel %vm1173_vm12, %v2551_v13, 8  ;;  %v2040_v59 = vsel %vm1346_vm14, 1.0, %v2217_v7  ;;  %vm1347_vm15 = vcmp.eq.s32.totalorder %v2551_v13, %v1315_v63 }
 0x1cb   : > { %v1325_v2 = vrot.slane %v1189_v47, 4  ;;  %v1394_v60 = vpack.c.bf16 %v2040_v59, %v2040_v59  ;;  %v2041_v3 = vsel %vm1347_vm15, 1.0, %v2217_v7  ;;  %vm1858_vm15 = vsmask.f32 512 }
 0x1cc   : > { %vm1317_vm2 = vcmp.lt.s32.totalorder %v1188_v37, %v1316_v57  ;;  %v1395_v5 = vpack.c.bf16 %v2041_v3, %v2041_v3 }
 0x1cd   : > { %v1318_v10 = vsel %vm1317_vm2, %v1188_v37, %v1316_v57  ;;  %vm1326_vm3 = vcmp.lt.s32.totalorder %v1189_v47, %v1325_v2  ;;  %v1441_v18 = vsel %vm1403_vm5, %v1394_v60, 0  ;;  %vm1824_vm2 = vcmask 1042434  }
 0x1ce   : > { %v1319_v19 = vrot.slane %v1318_v10, 2  ;;  %v1327_v21 = vsel %vm1326_vm3, %v1189_v47, %v1325_v2  ;;  %1615 = vmatpush.bf16.msrb.mxu0 %v1441_v18  ;;  %v1444_v1 = vsel %vm1403_vm5, %v1395_v5, 0  ;;  %vm2679_vm3 = vmand %vm389_vm0, %vm1858_vm15  ;;  %vm1873_vm15 = vsmask.f32 4608 }
 0x1cf   : > { %v1328_v23 = vrot.slane %v1327_v21, 2  ;;  %1628 = vmatpush.bf16.msrb.mxu1 %v1444_v1 }
 0x1d0   : > { %vm1320_vm4 = vcmp.lt.s32.totalorder %v1318_v10, %v1319_v19 }
 0x1d1   : > { %vm1329_vm6 = vcmp.lt.s32.totalorder %v1327_v21, %v1328_v23  ;;  %v1321_v30 = vsel %vm1320_vm4, %v1318_v10, %v1319_v19  ;;  %2056 = vmatmul.msk.bf16.vlgmr.msrb.gmra.mxu0 %vm1399_vm13, %v2577_v0  ;;  %v1662_v10 = vmul.f32 0.5, %v271_v20  ;;  %vm1860_vm4 = vcmask 1041409  }
 0x1d2   : > { %v1322_v4 = vrot.slane %v1321_v30, 1  ;;  %v1330_v31 = vsel %vm1329_vm6, %v1327_v21, %v1328_v23  ;;  %2057 = vmatmul.msk.bf16.vlgmr.msrb.gmra.mxu1 %vm1399_vm13, %v2577_v0  ;;  %vm1861_vm6 = vsmask.f32 1536 }
 0x1d3   : > { %v1331_v34 = vrot.slane %v1330_v31, 1 }
 0x1d4   : > { %vm1323_vm7 = vcmp.lt.s32.totalorder %v1321_v30, %v1322_v4 }
 0x1d5   : > { %v1324_v35 = vsel %vm1323_vm7, %v1321_v30, %v1322_v4  ;;  %vm1332_vm8 = vcmp.lt.s32.totalorder %v1330_v31, %v1331_v34  ;;  %vm1865_vm7 = vsmask.f32 2560 }
 0x1d6   : > { %vm1348_vm9 = vcmp.eq.s32.totalorder %v2551_v13, %v1324_v35  ;;  %v1333_v15 = vsel %vm1332_vm8, %v1330_v31, %v1331_v34  ;;  %vm1862_vm8 = vmand %vm1860_vm4, %vm1861_vm6  ;;  %vm1876_vm6 = vcmask 1045509  }
 0x1d7   : > { %v2042_v54 = vsel %vm1348_vm9, 1.0, %v2217_v7  ;;  %vm1349_vm10 = vcmp.eq.s32.totalorder %v2551_v13, %v1333_v15  ;;  %v1660_v13 = vmul.f32 0.5, %v269_v11  ;;  %vm1863_vm9 = vmor %vm1862_vm8, %vm2679_vm3  ;;  %vm1833_vm8 = vcmask 1046534  }
 0x1d8   : > { %v1396_v24 = vpack.c.bf16 %v2042_v54, %v2042_v54  ;;  %v2043_v42 = vsel %vm1349_vm10, 1.0, %v2217_v7  ;;  %vm1868_vm10 = vcmask 1043459  }
 0x1d9   : > { %v1397_v39 = vpack.c.bf16 %v2043_v42, %v2043_v42 }
 0x1da   : > { %v1447_v36 = vsel %vm1403_vm5, %v1396_v24, 0  ;;  %v1663_v24 = vmul.f32 0.5, %v272_v14 }
 0x1db   : > { %1641 = vmatpush.bf16.msrb.mxu2 %v1447_v36  ;;  %v1450_v52 = vsel %vm1403_vm5, %v1397_v39, 0 }
 0x1dc   : > { %1654 = vmatpush.bf16.msrb.mxu3 %v1450_v52 }
 0x1de   : > { %2058 = vmatmul.msk.bf16.vlgmr.msrb.gmra.mxu2 %vm1399_vm13, %v2577_v0 }
 0x1df   : > { %2059 = vmatmul.msk.bf16.vlgmr.msrb.gmra.mxu3 %vm1399_vm13, %v2577_v0 }
 0x1f0   : > { %v1474_v41 = vpop.f32.mrf.mxu1  ;;  %v1461_v44 = vpop.f32.mrf.mxu0 }
 0x1f1   : > { %v1669_v33 = vmul.f32 0.5, %v1474_v41  ;;  %v1668_v7 = vmul.f32 0.5, %v1461_v44 }
 0x1f3   : > { %v1700_v45 = vrot.slane %v1669_v33, 4 }
 0x1f5   : > { %v1708_v49 = vsel %vm1403_vm5, %v1668_v7, %v1700_v45 }
 0x1f6   : > { %v1724_v50 = vadd.f32 %v1708_v49, %v1660_v13 }
 0x1f8   : > { %v1732_v43 = vmin.f32 %v1724_v50, 255.0  ;;  %v1476_v53 = vpop.f32.mrf.mxu1  ;;  %v1463_v28 = vpop.f32.mrf.mxu0 }
 0x1fa   : > { %vm2066_vm11 = vcmp.lt.s32.totalorder %v1732_v43, 0  ;;  %v2067_v38 = vceil.f32 %v1732_v43  ;;  %v2068_v46 = vfloor.f32 %v1732_v43 }
 0x1fc   : > { %v2069_v56 = vsel %vm2066_vm11, %v2067_v38, %v2068_v46  ;;  %vm1869_vm11 = vsmask.f32 3584 }
 0x1fd   : > { %v2070_v58 = vcvt.f32.s32 %v2069_v56  ;;  %vm2693_vm4 = vmand %vm1868_vm10, %vm1869_vm11  ;;  %vm1881_vm10 = vsmask.f32 6656 }
 0x1ff   : > { %1748 = vst [vmem:[#allocation1] ss:$2 sm:$0xff] %v2070_v58  ;;  %v1664_v58 = vmul.f32 0.5, %v273_v26 }
 0x201   : > { %v1487_v51 = vpop.f32.mrf.mxu2 }
 0x202   : > { %v1500_v55 = vpop.f32.mrf.mxu3  ;;  %v1670_v48 = vmul.f32 0.5, %v1487_v51 }
 0x203   : > { %v1671_v0 = vmul.f32 0.5, %v1500_v55 }
 0x205   : > { %v1701_v11 = vrot.slane %v1671_v0, 4 }
 0x206   : > { %v1756_v41 = vld.sshfl [vmem:[#allocation1 + $0x8] sm:$0xff pattern:$0x75316420] }
 0x207   : > { %v1709_v62 = vsel %vm1403_vm5, %v1670_v48, %v1701_v11  ;;  %v1777_v51 = vpack.c.b16 %v1756_v41, %v1756_v41 }
 0x208   : > { %v1725_v37 = vadd.f32 %v1709_v62, %v1661_v6  ;;  %v1755_v6 = vld.sshfl [vmem:[#allocation1] sm:$0xff pattern:$0x75316420] }
 0x209   : > { %v1489_v61 = vpop.f32.mrf.mxu2  ;;  %v1778_v11 = vpack.c.b8 %v1777_v51, %v1777_v51 }
 0x20a   : > { %v1733_v57 = vmin.f32 %v1725_v37, 255.0  ;;  %v1502_v47 = vpop.f32.mrf.mxu3 }
 0x20c   : > { %vm2071_vm13 = vcmp.lt.s32.totalorder %v1733_v57, 0  ;;  %v2072_v3 = vceil.f32 %v1733_v57  ;;  %v2073_v5 = vfloor.f32 %v1733_v57 }
 0x20e   : > { %v1513_v63 = vpop.f32.mrf.mxu0  ;;  %v2074_v12 = vsel %vm2071_vm13, %v2072_v3, %v2073_v5  ;;  %vm1866_vm13 = vmand %vm1824_vm2, %vm1865_vm7  ;;  %vm1877_vm7 = vsmask.f32 5632 }
 0x20f   : > { %v1526_v59 = vpop.f32.mrf.mxu1  ;;  %v1672_v60 = vmul.f32 0.5, %v1513_v63  ;;  %v2075_v18 = vcvt.f32.s32 %v2074_v12 }
 0x210   : > { %v1673_v2 = vmul.f32 0.5, %v1526_v59  ;;  %v1775_v59 = vpack.c.b16 %v1755_v6, %v1755_v6 }
 0x211   : > { %1750 = vst [vmem:[#allocation1 + $0x10] ss:$2 sm:$0xff] %v2075_v18 }
 0x212   : > { %v1702_v8 = vrot.slane %v1673_v2, 4 }
 0x214   : > { %v1710_v19 = vsel %vm1403_vm5, %v1672_v60, %v1702_v8  ;;  %v1807_v60 = vrot.slane %v1778_v11, 7 }
 0x215   : > { %v1726_v21 = vadd.f32 %v1710_v19, %v1662_v10 }
 0x216   : > { %v1515_v1 = vpop.f32.mrf.mxu0 }
 0x217   : > { %v1734_v23 = vmin.f32 %v1726_v21, 255.0  ;;  %v1528_v30 = vpop.f32.mrf.mxu1 }
 0x218   : > { %v1757_v13 = vld.sshfl [vmem:[#allocation1 + $0x10] sm:$0xff pattern:$0x75316420]  ;;  %v1758_v7 = vld.sshfl [vmem:[#allocation1 + $0x18] sm:$0xff pattern:$0x75316420] }
 0x219   : > { %vm2076_vm12 = vcmp.lt.s32.totalorder %v1734_v23, 0  ;;  %v2077_v4 = vceil.f32 %v1734_v23  ;;  %v2078_v31 = vfloor.f32 %v1734_v23  ;;  %v1779_v43 = vpack.c.b16 %v1757_v13, %v1757_v13 }
 0x21a   : > { %v1781_v14 = vpack.c.b16 %v1758_v7, %v1758_v7  ;;  %v1776_v23 = vpack.c.b8 %v1775_v59, %v1775_v59 }
 0x21b   : > { %v2079_v34 = vsel %vm2076_vm12, %v2077_v4, %v2078_v31  ;;  %v1780_v61 = vpack.c.b8 %v1779_v43, %v1779_v43  ;;  %vm1829_vm12 = vcmask 1044484  }
 0x21c   : > { %v2080_v35 = vcvt.f32.s32 %v2079_v34  ;;  %v1782_v63 = vpack.c.b8 %v1781_v14, %v1781_v14 }
 0x21d   : > { %v1808_v10 = vrot.slane %v1780_v61, 6 }
 0x21e   : > { %1752 = vst [vmem:[#allocation1 + $0x20] ss:$2 sm:$0xff] %v2080_v35  ;;  %v1809_v8 = vrot.slane %v1782_v63, 5 }
 0x221   : > { %v1539_v15 = vpop.f32.mrf.mxu2 }
 0x222   : > { %v1552_v54 = vpop.f32.mrf.mxu3  ;;  %v1674_v20 = vmul.f32 0.5, %v1539_v15 }
 0x223   : > { %v1675_v16 = vmul.f32 0.5, %v1552_v54 }
 0x225   : > { %v1703_v42 = vrot.slane %v1675_v16, 4  ;;  %v1759_v50 = vld.sshfl [vmem:[#allocation1 + $0x20] sm:$0xff pattern:$0x75316420] }
 0x226   : > { %v1760_v9 = vld.sshfl [vmem:[#allocation1 + $0x28] sm:$0xff pattern:$0x75316420]  ;;  %v1783_v55 = vpack.c.b16 %v1759_v50, %v1759_v50 }
 0x227   : > { %v1711_v39 = vsel %vm1403_vm5, %v1674_v20, %v1703_v42  ;;  %v1785_v62 = vpack.c.b16 %v1760_v9, %v1760_v9 }
 0x228   : > { %v1727_v36 = vadd.f32 %v1711_v39, %v1663_v24  ;;  %v1784_v57 = vpack.c.b8 %v1783_v55, %v1783_v55  ;;  %v1823_v39 = vsel %vm389_vm0, %v1776_v23, %v1807_v60 }
 0x229   : > { %v1541_v52 = vpop.f32.mrf.mxu2  ;;  %v1786_v2 = vpack.c.b8 %v1785_v62, %v1785_v62 }
 0x22a   : > { %v1735_v33 = vmin.f32 %v1727_v36, 255.0  ;;  %v1554_v44 = vpop.f32.mrf.mxu3  ;;  %v1810_v19 = vrot.slane %v1784_v57, 4  ;;  %v1827_v36 = vsel %vm1824_vm2, %v1808_v10, %v1809_v8 }
 0x22b   : > { %v1811_v54 = vrot.slane %v1786_v2, 3  ;;  %v1828_v7 = vsel %vm390_vm1, %v1823_v39, %v1827_v36 }
 0x22c   : > { %vm2081_vm14 = vcmp.lt.s32.totalorder %v1735_v33, 0  ;;  %v2082_v45 = vceil.f32 %v1735_v33  ;;  %v2083_v49 = vfloor.f32 %v1735_v33 }
 0x22d   : > { %v1832_v13 = vsel %vm1829_vm12, %v1810_v19, %v1811_v54 }
 0x22e   : > { %v2084_v53 = vsel %vm2081_vm14, %v2082_v45, %v2083_v49  ;;  %v1565_v28 = vpop.f32.mrf.mxu0  ;;  %vm2689_vm14 = vmor %vm1866_vm13, %vm1863_vm9  ;;  %v1888_v49 = vld [vmem:[%s2739_s19] sm:$0xff] }
 0x22f   : > { %v2085_v38 = vcvt.f32.s32 %v2084_v53  ;;  %v1578_v46 = vpop.f32.mrf.mxu1  ;;  %v1676_v48 = vmul.f32 0.5, %v1565_v28  ;;  %vm1871_vm3 = vmor %vm2693_vm4, %vm2689_vm14  ;;  %vm1884_vm4 = vcmask 1047559  }
 0x230   : > { %v1677_v56 = vmul.f32 0.5, %v1578_v46  ;;  %vm1874_vm9 = vmand %vm1829_vm12, %vm1873_vm15 }
 0x231   : > { %1754 = vst [vmem:[#allocation1 + $0x30] ss:$2 sm:$0xff] %v2085_v38  ;;  %vm2704_vm11 = vmor %vm1874_vm9, %vm1871_vm3  ;;  %vm1885_vm3 = vsmask.f32 7680  ;;  %v1665_v38 = vmul.f32 0.5, %v274_v29 }
 0x232   : > { %v1704_v37 = vrot.slane %v1677_v56, 4  ;;  %vm2710_vm14 = vmand %vm1876_vm6, %vm1877_vm7 }
 0x233   : > { %vm1879_vm15 = vmor %vm2710_vm14, %vm2704_vm11 }
 0x234   : > { %v1712_v47 = vsel %vm1403_vm5, %v1676_v48, %v1704_v37  ;;  %vm1882_vm9 = vmand %vm1833_vm8, %vm1881_vm10  ;;  %vm1837_vm10 = vcmask 1045508  }
 0x235   : > { %v1728_v26 = vadd.f32 %v1712_v47, %v1664_v58  ;;  %vm2724_vm6 = vmor %vm1882_vm9, %vm1879_vm15 }
 0x236   : > { %v1567_v5 = vpop.f32.mrf.mxu0  ;;  %vm2728_vm7 = vmand %vm1884_vm4, %vm1885_vm3 }
 0x237   : > { %v1736_v12 = vmin.f32 %v1728_v26, 255.0  ;;  %v1580_v18 = vpop.f32.mrf.mxu1  ;;  %vm1887_vm11 = vmor %vm2728_vm7, %vm2724_vm6 }
 0x238   : > { %v1761_v21 = vld.sshfl [vmem:[#allocation1 + $0x30] sm:$0xff pattern:$0x75316420]  ;;  %v1762_v1 = vld.sshfl [vmem:[#allocation1 + $0x38] sm:$0xff pattern:$0x75316420] }
 0x239   : > { %vm2086_vm13 = vcmp.lt.s32.totalorder %v1736_v12, 0  ;;  %v2087_v4 = vceil.f32 %v1736_v12  ;;  %v2088_v31 = vfloor.f32 %v1736_v12  ;;  %v1787_v34 = vpack.c.b16 %v1761_v21, %v1761_v21 }
 0x23a   : > { %v1789_v15 = vpack.c.b16 %v1762_v1, %v1762_v1 }
 0x23b   : > { %v2089_v16 = vsel %vm2086_vm13, %v2087_v4, %v2088_v31  ;;  %v1788_v20 = vpack.c.b8 %v1787_v34, %v1787_v34 }
 0x23c   : > { %v2090_v24 = vcvt.f32.s32 %v2089_v16  ;;  %v1790_v42 = vpack.c.b8 %v1789_v15, %v1789_v15 }
 0x23d   : > { %v1812_v41 = vrot.slane %v1788_v20, 2 }
 0x23e   : > { %1763 = vst [vmem:[#allocation1] ss:$2 sm:$0xff] %v2090_v24  ;;  %v1813_v44 = vrot.slane %v1790_v42, 1 }
 0x240   : > { %v1836_v45 = vsel %vm1833_vm8, %v1812_v41, %v1813_v44 }
 0x241   : > { %v1591_v50 = vpop.f32.mrf.mxu2  ;;  %v1838_v51 = vsel %vm1837_vm10, %v1832_v13, %v1836_v45 }
 0x242   : > { %v1604_v43 = vpop.f32.mrf.mxu3  ;;  %v1839_v53 = vsel %vm1403_vm5, %v1828_v7, %v1838_v51  ;;  %v1678_v9 = vmul.f32 0.5, %v1591_v50 }
 0x243   : > { %v1679_v28 = vmul.f32 0.5, %v1604_v43  ;;  %v1889_v14 = vsel %vm1887_vm11, %v1839_v53, %v1888_v49 }
 0x244   : > { %1890 = vst [vmem:[%s2739_s19] sm:$0xff] %v1889_v14 }
 0x245   : > { %v1705_v46 = vrot.slane %v1679_v28, 4  ;;  %v1768_v34 = vld.sshfl [vmem:[#allocation1 + $0x8] sm:$0xff pattern:$0x75316420] }
 0x246   : > { %v1793_v36 = vpack.c.b16 %v1768_v34, %v1768_v34  ;;  %v1767_v41 = vld.sshfl [vmem:[#allocation1] sm:$0xff pattern:$0x75316420] }
 0x247   : > { %v1713_v55 = vsel %vm1403_vm5, %v1678_v9, %v1705_v46  ;;  %v1791_v50 = vpack.c.b16 %v1767_v41, %v1767_v41 }
 0x248   : > { %v1729_v0 = vadd.f32 %v1713_v55, %v1665_v38  ;;  %v1794_v7 = vpack.c.b8 %v1793_v36, %v1793_v36 }
 0x249   : > { %v1593_v56 = vpop.f32.mrf.mxu2  ;;  %v1792_v46 = vpack.c.b8 %v1791_v50, %v1791_v50 }
 0x24a   : > { %v1737_v48 = vmin.f32 %v1729_v0, 255.0  ;;  %v1606_v58 = vpop.f32.mrf.mxu3  ;;  %v1814_v53 = vrot.slane %v1794_v7, 7 }
 0x24c   : > { %vm2091_vm13 = vcmp.lt.s32.totalorder %v1737_v48, 0  ;;  %v2092_v6 = vceil.f32 %v1737_v48  ;;  %v2093_v11 = vfloor.f32 %v1737_v48 }
 0x24e   : > { %v2094_v61 = vsel %vm2091_vm13, %v2092_v6, %v2093_v11  ;;  %v1617_v62 = vpop.f32.mrf.mxu0  ;;  %v1843_v11 = vsel %vm389_vm0, %v1792_v46, %v1814_v53 }
 0x24f   : > { %v2095_v37 = vcvt.f32.s32 %v2094_v61  ;;  %v1630_v63 = vpop.f32.mrf.mxu1  ;;  %v1680_v47 = vmul.f32 0.5, %v1617_v62 }
 0x250   : > { %v1681_v57 = vmul.f32 0.5, %v1630_v63 }
 0x251   : > { %1764 = vst [vmem:[#allocation1 + $0x10] ss:$2 sm:$0xff] %v2095_v37 }
 0x252   : > { %v1706_v29 = vrot.slane %v1681_v57, 4 }
 0x254   : > { %v1714_v59 = vsel %vm1403_vm5, %v1680_v47, %v1706_v29  ;;  %v1891_v47 = vld [vmem:[%s2739_s19 + $0x8] sm:$0xff] }
 0x255   : > { %v1730_v17 = vadd.f32 %v1714_v59, %v1666_v22 }
 0x256   : > { %v1619_v26 = vpop.f32.mrf.mxu0 }
 0x257   : > { %v1738_v2 = vmin.f32 %v1730_v17, 255.0  ;;  %v1632_v60 = vpop.f32.mrf.mxu1 }
 0x258   : > { %v1769_v35 = vld.sshfl [vmem:[#allocation1 + $0x10] sm:$0xff pattern:$0x75316420]  ;;  %v1770_v16 = vld.sshfl [vmem:[#allocation1 + $0x18] sm:$0xff pattern:$0x75316420] }
 0x259   : > { %vm2096_vm14 = vcmp.lt.s32.totalorder %v1738_v2, 0  ;;  %v2097_v3 = vceil.f32 %v1738_v2  ;;  %v2098_v5 = vfloor.f32 %v1738_v2  ;;  %v1795_v25 = vpack.c.b16 %v1769_v35, %v1769_v35 }
 0x25a   : > { %v1797_v32 = vpack.c.b16 %v1770_v16, %v1770_v16 }
 0x25b   : > { %v2099_v10 = vsel %vm2096_vm14, %v2097_v3, %v2098_v5  ;;  %v1796_v45 = vpack.c.b8 %v1795_v25, %v1795_v25 }
 0x25c   : > { %v2100_v8 = vcvt.f32.s32 %v2099_v10  ;;  %v1798_v49 = vpack.c.b8 %v1797_v32, %v1797_v32 }
 0x25d   : > { %v1815_v28 = vrot.slane %v1796_v45, 6 }
 0x25e   : > { %1765 = vst [vmem:[#allocation1 + $0x20] ss:$2 sm:$0xff] %v2100_v8  ;;  %v1816_v9 = vrot.slane %v1798_v49, 5 }
 0x260   : > { %v1846_v37 = vsel %vm1824_vm2, %v1815_v28, %v1816_v9 }
 0x261   : > { %v1643_v12 = vpop.f32.mrf.mxu2  ;;  %v1847_v22 = vsel %vm390_vm1, %v1843_v11, %v1846_v37 }
 0x262   : > { %v1656_v18 = vpop.f32.mrf.mxu3  ;;  %v1682_v21 = vmul.f32 0.5, %v1643_v12 }
 0x263   : > { %v1683_v19 = vmul.f32 0.5, %v1656_v18 }
 0x265   : > { %v1707_v40 = vrot.slane %v1683_v19, 4  ;;  %v1771_v24 = vld.sshfl [vmem:[#allocation1 + $0x20] sm:$0xff pattern:$0x75316420] }
 0x266   : > { %v1772_v42 = vld.sshfl [vmem:[#allocation1 + $0x28] sm:$0xff pattern:$0x75316420]  ;;  %v1799_v44 = vpack.c.b16 %v1771_v24, %v1771_v24 }
 0x267   : > { %v1715_v1 = vsel %vm1403_vm5, %v1682_v21, %v1707_v40  ;;  %v1801_v13 = vpack.c.b16 %v1772_v42, %v1772_v42 }
 0x268   : > { %v1731_v23 = vadd.f32 %v1715_v1, %v1667_v27  ;;  %v1800_v51 = vpack.c.b8 %v1799_v44, %v1799_v44 }
 0x269   : > { %v1645_v30 = vpop.f32.mrf.mxu2  ;;  %v1802_v43 = vpack.c.b8 %v1801_v13, %v1801_v13 }
 0x26a   : > { %v1739_v4 = vmin.f32 %v1731_v23, 255.0  ;;  %v1658_v31 = vpop.f32.mrf.mxu3  ;;  %v1817_v56 = vrot.slane %v1800_v51, 4 }
 0x26b   : > { %v1818_v48 = vrot.slane %v1802_v43, 3 }
 0x26c   : > { %vm2101_vm15 = vcmp.lt.s32.totalorder %v1739_v4, 0  ;;  %v2102_v15 = vceil.f32 %v1739_v4  ;;  %v2103_v54 = vfloor.f32 %v1739_v4 }
 0x26d   : > { %v1850_v63 = vsel %vm1829_vm12, %v1817_v56, %v1818_v48 }
 0x26e   : > { %v2104_v20 = vsel %vm2101_vm15, %v2102_v15, %v2103_v54 }
 0x26f   : > { %v2105_v39 = vcvt.f32.s32 %v2104_v20 }
 0x271   : > { %1766 = vst [vmem:[#allocation1 + $0x30] ss:$2 sm:$0xff] %v2105_v39 }
 0x278   : > { %v1773_v14 = vld.sshfl [vmem:[#allocation1 + $0x30] sm:$0xff pattern:$0x75316420]  ;;  %v1774_v38 = vld.sshfl [vmem:[#allocation1 + $0x38] sm:$0xff pattern:$0x75316420] }
 0x279   : > { %v1803_v55 = vpack.c.b16 %v1773_v14, %v1773_v14  ;;  %v1805_v0 = vpack.c.b16 %v1774_v38, %v1774_v38 }
 0x27b   : > { %v1804_v58 = vpack.c.b8 %v1803_v55, %v1803_v55  ;;  %v1806_v6 = vpack.c.b8 %v1805_v0, %v1805_v0 }
 0x27d   : > { %v1819_v61 = vrot.slane %v1804_v58, 2  ;;  %v1820_v62 = vrot.slane %v1806_v6, 1 }
 0x27f   : > { %v1853_v57 = vsel %vm1833_vm8, %v1819_v61, %v1820_v62 }
 0x280   : > { %v1854_v29 = vsel %vm1837_vm10, %v1850_v63, %v1853_v57 }
 0x281   : > { %v1855_v59 = vsel %vm1403_vm5, %v1847_v22, %v1854_v29 }
 0x282   : > { %v1892_v17 = vsel %vm1887_vm11, %v1855_v59, %v1891_v47 }
 0x283   : > { %1893 = vst [vmem:[%s2739_s19 + $0x8] sm:$0xff] %v1892_v17 }
 0x284   : > { %2178 = shalt.err (!%p2175_p3)
}
 0x285   : > { %2106 = dma.vmem_to_hbm [thread:$0]  (%p2288_p5), %s1908_s28, 256, %s1910_s29, %s1895_s9  }
 0x286 PF: > { %p2112_p4 = scmp.ge.s32.totalorder %s2213_s24, 2  ;;  %s1921_s17 = sand.u32 1, %s2201_s21  }
 0x287   : > { %s1922_s18 = scalar_lea.sflag [#allocation3], %s1921_s17 }
 0x288   : > { %p2109_p7 = pnand %p2112_p4, %p2292_p6 }
 0x28a   : > { %p2110_p8 = pneg %p2109_p7 }
 0x28c   : > { %2196 = dma.done.wait (%p2110_p8), %s1922_s18, 256  }
 0x28d   : > { %2198 = vsyncadd (%p2110_p8), %s1922_s18, 4294967040  ;;  %p16_p9 = scmp.ge.s32.totalorder %s2276_s27, 4   ;;  %s2830_s21 = smov %s2205_s22 }
 0x28e   : > { %s2831_s22 = smov %s2209_s23  ;;  %s2832_s23 = smov %s2286_s30 }
 0x28f   : > { %s2833_s24 = smov %s2276_s27  ;;  %18 = sbr.rel (!%p16_p9) target bundleno = 3 (0x3), region = 85 }
 0x294   :  { %1928 = vsyncpa [#allocation3], 1 }
 0x295   :  { %1930 = vsyncpa [#allocation3 + $0x1], 1 }

</bundles_post_ra>
